<compile_context>
chip_gen: v7x
topology: tpu7x:2x2x1
jax: 0.10.0
libtpu: 0.0.40
codegen_flags: <defaults>
</compile_context>

<pallas_src>
import math

import jax
import jax.numpy as jnp
import numpy as np
from jax.experimental import pallas as pl
from jax.experimental.pallas import tpu as pltpu


def _round_up(x, m):
    return ((x + m - 1) // m) * m


# ----------------------------------------------------------------------------
# Kernel body
# ----------------------------------------------------------------------------
def _beamformer_kernel(xr_ref, xi_ref, wr_ref, wi_ref, br_ref, bi_ref):
    # xr_ref / xi_ref : (1, C, F_blk, T_blk)
    # wr_ref / wi_ref : (B, C, F_blk, 1)   -- F on sublanes, lane-splat over T
    # br_ref / bi_ref : (1, B, F_blk, T_blk)
    _, C, F_blk, T_blk = xr_ref.shape
    B = br_ref.shape[1]
    acc = jnp.float32

    # F sub-chunk size: keep the live working set (per-channel xr/xs/xd slabs
    # shared across beams + the two per-beam accumulators) around the size of
    # the vreg file so Mosaic does not spill/reload accumulators every channel
    # iteration.  Also bound the number of unrolled chunks for compile time.
    vreg_budget_elems = (224 * 1024) // 4            # ~224 KiB of f32
    live_slabs = 3 * C + 4
    fsub = vreg_budget_elems // max(live_slabs * T_blk, 1)
    fsub = max(8, (fsub // 8) * 8)
    min_fsub = _round_up(-(-F_blk // 32), 8)         # at most ~32 chunks
    fsub = min(F_blk, max(fsub, min_fsub))

    for f0 in range(0, F_blk, fsub):
        f1 = min(F_blk, f0 + fsub)
        # Per-channel x slabs for this f-chunk, shared across all beams.
        xr_c, xs_c, xd_c = [], [], []
        for c in range(C):
            r = xr_ref[0, c, f0:f1, :].astype(acc)   # (fsub, T_blk)
            i = xi_ref[0, c, f0:f1, :].astype(acc)
            xr_c.append(r)
            xs_c.append(r + i)                       # xr + xi
            xd_c.append(i - r)                       # xi - xr
        for b in range(B):
            br_acc = None
            bi_acc = None
            for c in range(C):
                wr = wr_ref[b, c, f0:f1, :].astype(acc)   # (fsub, 1) lane-splat
                wi = wi_ref[b, c, f0:f1, :].astype(acc)
                # Gauss 3-mult complex trick.
                k1 = (wr - wi) * xr_c[c]
                k2 = wr * xd_c[c]
                k3 = wi * xs_c[c]
                if br_acc is None:
                    br_acc = k1 + k3
                    bi_acc = k1 + k2
                else:
                    br_acc = br_acc + (k1 + k3)
                    bi_acc = bi_acc + (k1 + k2)
            br_ref[0, b, f0:f1, :] = br_acc.astype(br_ref.dtype)
            bi_ref[0, b, f0:f1, :] = bi_acc.astype(bi_ref.dtype)


# ----------------------------------------------------------------------------
# Tiling / VMEM accounting
# ----------------------------------------------------------------------------
def _vmem_capacity_bytes():
    try:
        return max(int(pltpu.get_tpu_info().vmem_capacity_bytes), 64 << 20)
    except Exception:
        return 64 << 20          # conservative: v7x per-TensorCore VMEM


def _resident_bytes(B, C, f_tile, t_tile, itemsize):
    """Pipeline-buffer footprint, using padded (8,128) buffer shapes and the
    128-lane padding of the (B,C,f_tile,1) weight blocks (2 buffers each)."""
    f_buf = _round_up(f_tile, 8)
    t_buf = _round_up(t_tile, 128)
    x_bytes = 2 * 2 * C * f_buf * t_buf * itemsize          # xr, xi
    o_bytes = 2 * 2 * B * f_buf * t_buf * itemsize          # br, bi
    w_bytes = 2 * 2 * B * C * f_buf * 128 * itemsize        # wr, wi (lane-padded)
    return x_bytes + o_bytes + w_bytes


def _choose_tiles(B, C, F, T, itemsize, budget_bytes):
    # T candidates: full T (exempt from the 128 rule) if small, else lane-dense
    # multiples of 128 (no host-side padding -- ragged edge tile is masked).
    if T <= 512:
        t_cands = [T]
    else:
        t_cands = [512, 256, 128]
    # F candidates: full F first (weights DMA'd once, no 8-divisibility
    # requirement), then shrinking multiples of 8.
    f_cands = [F]
    f = _round_up(F, 8) // 2
    while f >= 8:
        fc = _round_up(f, 8)
        if fc < F and fc not in f_cands:
            f_cands.append(fc)
        f //= 2

    best = None
    for f_tile in f_cands:               # prefer full F
        for t_tile in t_cands:           # prefer larger T
            r = _resident_bytes(B, C, f_tile, t_tile, itemsize)
            if r <= budget_bytes:
                return f_tile, t_tile
            if best is None or r < best[2]:
                best = (f_tile, t_tile, r)
    return best[0], best[1]              # nothing fits: smallest footprint


def _ensure_multiple_grid_points(N, F, T, f_tile, t_tile):
    """v7x has 2 TensorCores: make sure the 'parallel' grid has >= 2 steps."""
    points = N * pl.cdiv(F, f_tile) * pl.cdiv(T, t_tile)
    if points >= 2:
        return f_tile, t_tile
    if T > 256 and t_tile == T:
        return f_tile, _round_up(pl.cdiv(T, 2), 128)
    if F >= 16 and f_tile == F:
        return _round_up(pl.cdiv(F, 2), 8), t_tile
    return f_tile, t_tile


# ----------------------------------------------------------------------------
# Public wrapper
# ----------------------------------------------------------------------------
def fixed_beamformer(xr, xi, w_real, w_imag, *, beam=None, squeeze=False,
                     trans=False, cplx=True, tile_override=None):
    """Pallas implementation of FixedBeamformer.forward (beam=None path)."""
    if beam is not None:
        # TODO(synk): beam-indexed path (per-batch weight gather w[beam]) not implemented in-kernel.
        raise NotImplementedError("beam-indexed path not implemented")

    N, C, F, T = xr.shape
    assert xi.shape == xr.shape
    if w_real.ndim == 3:                 # accept (B, C, F); canonical is (B, C, F, 1)
        w_real = w_real[..., None]
        w_imag = w_imag[..., None]
    B = w_real.shape[0]
    assert w_real.shape == (B, C, F, 1) and w_imag.shape == (B, C, F, 1)

    itemsize = jnp.dtype(xr.dtype).itemsize
    cap = _vmem_capacity_bytes()
    budget = min(int(cap * 0.35), 56 << 20)

    if tile_override is not None:
        F_tile, T_tile = tile_override
    else:
        F_tile, T_tile = _choose_tiles(B, C, F, T, itemsize, budget)
        F_tile, T_tile = _ensure_multiple_grid_points(N, F, T, F_tile, T_tile)
    resident = _resident_bytes(B, C, F_tile, T_tile, itemsize)

    grid = (N, pl.cdiv(F, F_tile), pl.cdiv(T, T_tile))

    x_spec = pl.BlockSpec((1, C, F_tile, T_tile), lambda n, fi, ti: (n, 0, fi, ti))
    o_spec = pl.BlockSpec((1, B, F_tile, T_tile), lambda n, fi, ti: (n, 0, fi, ti))
    if F_tile == F:
        # Constant block index: the weights are DMA'd into VMEM exactly once.
        w_spec = pl.BlockSpec((B, C, F, 1), lambda n, fi, ti: (0, 0, 0, 0))
    else:
        w_spec = pl.BlockSpec((B, C, F_tile, 1), lambda n, fi, ti: (0, 0, fi, 0))

    vmem_limit = int(min(max(2 * resident + (8 << 20), 32 << 20), int(cap * 0.6)))

    br, bi = pl.pallas_call(
        _beamformer_kernel,
        out_shape=(jax.ShapeDtypeStruct((N, B, F, T), xr.dtype),
                   jax.ShapeDtypeStruct((N, B, F, T), xr.dtype)),
        grid_spec=pltpu.PrefetchScalarGridSpec(
            num_scalar_prefetch=0,
            grid=grid,
            in_specs=[x_spec, x_spec, w_spec, w_spec],
            out_specs=[o_spec, o_spec],
        ),
        compiler_params=pltpu.CompilerParams(
            dimension_semantics=("parallel", "parallel", "parallel"),
            vmem_limit_bytes=vmem_limit,
        ),
    )(xr, xi, w_real, w_imag)

    # Glue matching the PyTorch flags.  Planar (br, bi) is the fast path; the
    # cplx / trans options below each cost one extra HBM pass over the output.
    if squeeze:
        br = jnp.squeeze(br)       # torch .squeeze(): drops ALL size-1 dims
        bi = jnp.squeeze(bi)
    if trans:
        # TODO(synk): could be folded into the output index_map with an F-as-lane layout variant.
        br = jnp.swapaxes(br, -1, -2)
        bi = jnp.swapaxes(bi, -1, -2)
    if cplx:
        # TODO(synk): could emit an interleaved output block in-kernel to avoid this extra pass.
        if br.dtype not in (jnp.float32, jnp.float64):
            br = br.astype(jnp.float32)
            bi = bi.astype(jnp.float32)
        return jax.lax.complex(br, bi)
    return br, bi


def init_beamformer_weights(key, num_beams, num_channels, num_bins, dtype=jnp.float32):
    """kaiming_uniform_(a=sqrt(5)) on a (2, B, C, F) tensor, matching PyTorch
    fan_in = B*C*F -> bound = 1/sqrt(fan_in).  Returns real/imag weights in the
    module's (B, C, F, 1) parameter layout."""
    fan_in = num_beams * num_channels * num_bins
    bound = 1.0 / math.sqrt(fan_in)
    w = jax.random.uniform(key, (2, num_beams, num_channels, num_bins),
                           minval=-bound, maxval=bound, dtype=dtype)
    return w[0][..., None], w[1][..., None]


def _reference(xr, xi, wr, wi):
    # Pure-JAX reference of the PyTorch broadcast/reduce (wr, wi: (B, C, F, 1)).
    r = xr[:, None]          # (N, 1, C, F, T)
    i = xi[:, None]
    wr_e = wr[None]          # (1, B, C, F, 1)
    wi_e = wi[None]
    br = jnp.sum(r * wr_e, axis=2) + jnp.sum(i * wi_e, axis=2)
    bi = jnp.sum(i * wr_e, axis=2) - jnp.sum(r * wi_e, axis=2)
    return br, bi


if __name__ == "__main__":
    # Primary small test (matches the module's expected shapes).
    N, B, C, F, T = 2, 6, 4, 16, 16   # batch, beams, channels, freq bins, frames
    key = jax.random.PRNGKey(0)
    kw, kr, ki = jax.random.split(key, 3)

    w_real, w_imag = init_beamformer_weights(kw, B, C, F)
    xr = jax.random.normal(kr, (N, C, F, T), dtype=jnp.float32)
    xi = jax.random.normal(ki, (N, C, F, T), dtype=jnp.float32)

    br, bi = fixed_beamformer(xr, xi, w_real, w_imag, cplx=False)
    br = jax.block_until_ready(br)
    bi = jax.block_until_ready(bi)

    ref_br, ref_bi = _reference(xr, xi, w_real, w_imag)
    assert br.shape == (N, B, F, T) and bi.shape == (N, B, F, T)
    np.testing.assert_allclose(np.asarray(br), np.asarray(ref_br), rtol=1e-5, atol=1e-5)
    np.testing.assert_allclose(np.asarray(bi), np.asarray(ref_bi), rtol=1e-5, atol=1e-5)

    # Complex return path (module default).
    out_c = jax.block_until_ready(fixed_beamformer(xr, xi, w_real, w_imag, cplx=True))
    assert out_c.dtype == jnp.complex64 and out_c.shape == (N, B, F, T)

    # Ragged-edge / multi-tile path: forced small tiles exercise masked edge
    # tiles (non-dividing F and T) and the pipelined weight spec.
    N2, B2, C2, F2, T2 = 1, 2, 3, 20, 300
    k2 = jax.random.split(key, 4)
    w2r, w2i = init_beamformer_weights(k2[0], B2, C2, F2)
    x2r = jax.random.normal(k2[1], (N2, C2, F2, T2), dtype=jnp.float32)
    x2i = jax.random.normal(k2[2], (N2, C2, F2, T2), dtype=jnp.float32)
    b2r, b2i = fixed_beamformer(x2r, x2i, w2r, w2i, cplx=False, tile_override=(8, 128))
    b2r = jax.block_until_ready(b2r)
    b2i = jax.block_until_ready(b2i)
    r2r, r2i = _reference(x2r, x2i, w2r, w2i)
    np.testing.assert_allclose(np.asarray(b2r), np.asarray(r2r), rtol=1e-5, atol=1e-5)
    np.testing.assert_allclose(np.asarray(b2i), np.asarray(r2i), rtol=1e-5, atol=1e-5)

    print("KERNEL_OK")
</pallas_src>

<mosaic_0001>
module attributes {stable_mosaic.version = 11 : i64} {
  func.func @_beamformer_kernel(%arg0: i32, %arg1: i32, %arg2: i32, %arg3: memref<1x4x16x16xf32, #tpu.memory_space<vmem>>, %arg4: memref<1x4x16x16xf32, #tpu.memory_space<vmem>>, %arg5: memref<6x4x16x1xf32, #tpu.memory_space<vmem>>, %arg6: memref<6x4x16x1xf32, #tpu.memory_space<vmem>>, %arg7: memref<1x6x16x16xf32, #tpu.memory_space<vmem>>, %arg8: memref<1x6x16x16xf32, #tpu.memory_space<vmem>>) attributes {dimension_semantics = [#tpu.dimension_semantics<parallel>, #tpu.dimension_semantics<parallel>, #tpu.dimension_semantics<parallel>], iteration_bounds = array<i64: 2, 1, 1>, scalar_prefetch = 0 : i64, scratch_operands = 0 : i64, tpu.core_type = #tpu.core_type<tc>, window_params = [{transform_indices = @transform_0, window_bounds = array<i64: 1, 4, 16, 16>}, {transform_indices = @transform_1, window_bounds = array<i64: 1, 4, 16, 16>}, {pipeline_mode = #tpu.pipeline_mode<synchronous>, transform_indices = @transform_2, window_bounds = array<i64: 6, 4, 16, 1>}, {pipeline_mode = #tpu.pipeline_mode<synchronous>, transform_indices = @transform_3, window_bounds = array<i64: 6, 4, 16, 1>}, {transform_indices = @transform_4, window_bounds = array<i64: 1, 6, 16, 16>}, {transform_indices = @transform_5, window_bounds = array<i64: 1, 6, 16, 16>}]} {
    %c0 = arith.constant 0 : index
    %c0_0 = arith.constant 0 : index
    %c0_1 = arith.constant 0 : index
    %c0_2 = arith.constant 0 : index
    %0 = vector.load %arg3[%c0, %c0_0, %c0_1, %c0_2] : memref<1x4x16x16xf32, #tpu.memory_space<vmem>>, vector<1x1x16x16xf32>
    %1 = vector.shape_cast %0 : vector<1x1x16x16xf32> to vector<16x16xf32>
    %c0_3 = arith.constant 0 : index
    %c0_4 = arith.constant 0 : index
    %c0_5 = arith.constant 0 : index
    %c0_6 = arith.constant 0 : index
    %2 = vector.load %arg4[%c0_3, %c0_4, %c0_5, %c0_6] : memref<1x4x16x16xf32, #tpu.memory_space<vmem>>, vector<1x1x16x16xf32>
    %3 = vector.shape_cast %2 : vector<1x1x16x16xf32> to vector<16x16xf32>
    %4 = arith.addf %1, %3 : vector<16x16xf32>
    %5 = arith.subf %3, %1 : vector<16x16xf32>
    %c0_7 = arith.constant 0 : index
    %c1 = arith.constant 1 : index
    %c0_8 = arith.constant 0 : index
    %c0_9 = arith.constant 0 : index
    %6 = vector.load %arg3[%c0_7, %c1, %c0_8, %c0_9] : memref<1x4x16x16xf32, #tpu.memory_space<vmem>>, vector<1x1x16x16xf32>
    %7 = vector.shape_cast %6 : vector<1x1x16x16xf32> to vector<16x16xf32>
    %c0_10 = arith.constant 0 : index
    %c1_11 = arith.constant 1 : index
    %c0_12 = arith.constant 0 : index
    %c0_13 = arith.constant 0 : index
    %8 = vector.load %arg4[%c0_10, %c1_11, %c0_12, %c0_13] : memref<1x4x16x16xf32, #tpu.memory_space<vmem>>, vector<1x1x16x16xf32>
    %9 = vector.shape_cast %8 : vector<1x1x16x16xf32> to vector<16x16xf32>
    %10 = arith.addf %7, %9 : vector<16x16xf32>
    %11 = arith.subf %9, %7 : vector<16x16xf32>
    %c0_14 = arith.constant 0 : index
    %c2 = arith.constant 2 : index
    %c0_15 = arith.constant 0 : index
    %c0_16 = arith.constant 0 : index
    %12 = vector.load %arg3[%c0_14, %c2, %c0_15, %c0_16] : memref<1x4x16x16xf32, #tpu.memory_space<vmem>>, vector<1x1x16x16xf32>
    %13 = vector.shape_cast %12 : vector<1x1x16x16xf32> to vector<16x16xf32>
    %c0_17 = arith.constant 0 : index
    %c2_18 = arith.constant 2 : index
    %c0_19 = arith.constant 0 : index
    %c0_20 = arith.constant 0 : index
    %14 = vector.load %arg4[%c0_17, %c2_18, %c0_19, %c0_20] : memref<1x4x16x16xf32, #tpu.memory_space<vmem>>, vector<1x1x16x16xf32>
    %15 = vector.shape_cast %14 : vector<1x1x16x16xf32> to vector<16x16xf32>
    %16 = arith.addf %13, %15 : vector<16x16xf32>
    %17 = arith.subf %15, %13 : vector<16x16xf32>
    %c0_21 = arith.constant 0 : index
    %c3 = arith.constant 3 : index
    %c0_22 = arith.constant 0 : index
    %c0_23 = arith.constant 0 : index
    %18 = vector.load %arg3[%c0_21, %c3, %c0_22, %c0_23] : memref<1x4x16x16xf32, #tpu.memory_space<vmem>>, vector<1x1x16x16xf32>
    %19 = vector.shape_cast %18 : vector<1x1x16x16xf32> to vector<16x16xf32>
    %c0_24 = arith.constant 0 : index
    %c3_25 = arith.constant 3 : index
    %c0_26 = arith.constant 0 : index
    %c0_27 = arith.constant 0 : index
    %20 = vector.load %arg4[%c0_24, %c3_25, %c0_26, %c0_27] : memref<1x4x16x16xf32, #tpu.memory_space<vmem>>, vector<1x1x16x16xf32>
    %21 = vector.shape_cast %20 : vector<1x1x16x16xf32> to vector<16x16xf32>
    %22 = arith.addf %19, %21 : vector<16x16xf32>
    %23 = arith.subf %21, %19 : vector<16x16xf32>
    %c0_28 = arith.constant 0 : index
    %c0_29 = arith.constant 0 : index
    %c0_30 = arith.constant 0 : index
    %c0_31 = arith.constant 0 : index
    %24 = vector.load %arg5[%c0_28, %c0_29, %c0_30, %c0_31] : memref<6x4x16x1xf32, #tpu.memory_space<vmem>>, vector<1x1x16x1xf32>
    %25 = vector.shape_cast %24 : vector<1x1x16x1xf32> to vector<16x1xf32>
    %c0_32 = arith.constant 0 : index
    %c0_33 = arith.constant 0 : index
    %c0_34 = arith.constant 0 : index
    %c0_35 = arith.constant 0 : index
    %26 = vector.load %arg6[%c0_32, %c0_33, %c0_34, %c0_35] : memref<6x4x16x1xf32, #tpu.memory_space<vmem>>, vector<1x1x16x1xf32>
    %27 = vector.shape_cast %26 : vector<1x1x16x1xf32> to vector<16x1xf32>
    %28 = arith.subf %25, %27 : vector<16x1xf32>
    %29 = vector.broadcast %28 : vector<16x1xf32> to vector<16x16xf32>
    %30 = arith.mulf %29, %1 : vector<16x16xf32>
    %31 = vector.broadcast %25 : vector<16x1xf32> to vector<16x16xf32>
    %32 = arith.mulf %31, %5 : vector<16x16xf32>
    %33 = vector.broadcast %27 : vector<16x1xf32> to vector<16x16xf32>
    %34 = arith.mulf %33, %4 : vector<16x16xf32>
    %35 = arith.addf %30, %34 : vector<16x16xf32>
    %36 = arith.addf %30, %32 : vector<16x16xf32>
    %c0_36 = arith.constant 0 : index
    %c1_37 = arith.constant 1 : index
    %c0_38 = arith.constant 0 : index
    %c0_39 = arith.constant 0 : index
    %37 = vector.load %arg5[%c0_36, %c1_37, %c0_38, %c0_39] : memref<6x4x16x1xf32, #tpu.memory_space<vmem>>, vector<1x1x16x1xf32>
    %38 = vector.shape_cast %37 : vector<1x1x16x1xf32> to vector<16x1xf32>
    %c0_40 = arith.constant 0 : index
    %c1_41 = arith.constant 1 : index
    %c0_42 = arith.constant 0 : index
    %c0_43 = arith.constant 0 : index
    %39 = vector.load %arg6[%c0_40, %c1_41, %c0_42, %c0_43] : memref<6x4x16x1xf32, #tpu.memory_space<vmem>>, vector<1x1x16x1xf32>
    %40 = vector.shape_cast %39 : vector<1x1x16x1xf32> to vector<16x1xf32>
    %41 = arith.subf %38, %40 : vector<16x1xf32>
    %42 = vector.broadcast %41 : vector<16x1xf32> to vector<16x16xf32>
    %43 = arith.mulf %42, %7 : vector<16x16xf32>
    %44 = vector.broadcast %38 : vector<16x1xf32> to vector<16x16xf32>
    %45 = arith.mulf %44, %11 : vector<16x16xf32>
    %46 = vector.broadcast %40 : vector<16x1xf32> to vector<16x16xf32>
    %47 = arith.mulf %46, %10 : vector<16x16xf32>
    %48 = arith.addf %43, %47 : vector<16x16xf32>
    %49 = arith.addf %35, %48 : vector<16x16xf32>
    %50 = arith.addf %43, %45 : vector<16x16xf32>
    %51 = arith.addf %36, %50 : vector<16x16xf32>
    %c0_44 = arith.constant 0 : index
    %c2_45 = arith.constant 2 : index
    %c0_46 = arith.constant 0 : index
    %c0_47 = arith.constant 0 : index
    %52 = vector.load %arg5[%c0_44, %c2_45, %c0_46, %c0_47] : memref<6x4x16x1xf32, #tpu.memory_space<vmem>>, vector<1x1x16x1xf32>
    %53 = vector.shape_cast %52 : vector<1x1x16x1xf32> to vector<16x1xf32>
    %c0_48 = arith.constant 0 : index
    %c2_49 = arith.constant 2 : index
    %c0_50 = arith.constant 0 : index
    %c0_51 = arith.constant 0 : index
    %54 = vector.load %arg6[%c0_48, %c2_49, %c0_50, %c0_51] : memref<6x4x16x1xf32, #tpu.memory_space<vmem>>, vector<1x1x16x1xf32>
    %55 = vector.shape_cast %54 : vector<1x1x16x1xf32> to vector<16x1xf32>
    %56 = arith.subf %53, %55 : vector<16x1xf32>
    %57 = vector.broadcast %56 : vector<16x1xf32> to vector<16x16xf32>
    %58 = arith.mulf %57, %13 : vector<16x16xf32>
    %59 = vector.broadcast %53 : vector<16x1xf32> to vector<16x16xf32>
    %60 = arith.mulf %59, %17 : vector<16x16xf32>
    %61 = vector.broadcast %55 : vector<16x1xf32> to vector<16x16xf32>
    %62 = arith.mulf %61, %16 : vector<16x16xf32>
    %63 = arith.addf %58, %62 : vector<16x16xf32>
    %64 = arith.addf %49, %63 : vector<16x16xf32>
    %65 = arith.addf %58, %60 : vector<16x16xf32>
    %66 = arith.addf %51, %65 : vector<16x16xf32>
    %c0_52 = arith.constant 0 : index
    %c3_53 = arith.constant 3 : index
    %c0_54 = arith.constant 0 : index
    %c0_55 = arith.constant 0 : index
    %67 = vector.load %arg5[%c0_52, %c3_53, %c0_54, %c0_55] : memref<6x4x16x1xf32, #tpu.memory_space<vmem>>, vector<1x1x16x1xf32>
    %68 = vector.shape_cast %67 : vector<1x1x16x1xf32> to vector<16x1xf32>
    %c0_56 = arith.constant 0 : index
    %c3_57 = arith.constant 3 : index
    %c0_58 = arith.constant 0 : index
    %c0_59 = arith.constant 0 : index
    %69 = vector.load %arg6[%c0_56, %c3_57, %c0_58, %c0_59] : memref<6x4x16x1xf32, #tpu.memory_space<vmem>>, vector<1x1x16x1xf32>
    %70 = vector.shape_cast %69 : vector<1x1x16x1xf32> to vector<16x1xf32>
    %71 = arith.subf %68, %70 : vector<16x1xf32>
    %72 = vector.broadcast %71 : vector<16x1xf32> to vector<16x16xf32>
    %73 = arith.mulf %72, %19 : vector<16x16xf32>
    %74 = vector.broadcast %68 : vector<16x1xf32> to vector<16x16xf32>
    %75 = arith.mulf %74, %23 : vector<16x16xf32>
    %76 = vector.broadcast %70 : vector<16x1xf32> to vector<16x16xf32>
    %77 = arith.mulf %76, %22 : vector<16x16xf32>
    %78 = arith.addf %73, %77 : vector<16x16xf32>
    %79 = arith.addf %64, %78 : vector<16x16xf32>
    %80 = arith.addf %73, %75 : vector<16x16xf32>
    %81 = arith.addf %66, %80 : vector<16x16xf32>
    %c0_60 = arith.constant 0 : index
    %c0_61 = arith.constant 0 : index
    %c0_62 = arith.constant 0 : index
    %c0_63 = arith.constant 0 : index
    %82 = vector.load %arg7[%c0_60, %c0_61, %c0_62, %c0_63] : memref<1x6x16x16xf32, #tpu.memory_space<vmem>>, vector<1x1x16x16xf32>
    %83 = vector.shape_cast %82 : vector<1x1x16x16xf32> to vector<16x16xf32>
    %84 = vector.shape_cast %79 : vector<16x16xf32> to vector<1x1x16x16xf32>
    tpu.vector_store %arg7[%c0_60, %c0_61, %c0_62, %c0_63], %84 {strides = array<i32>} : memref<1x6x16x16xf32, #tpu.memory_space<vmem>>, vector<1x1x16x16xf32>,
    %c0_64 = arith.constant 0 : index
    %c0_65 = arith.constant 0 : index
    %c0_66 = arith.constant 0 : index
    %c0_67 = arith.constant 0 : index
    %85 = vector.load %arg8[%c0_64, %c0_65, %c0_66, %c0_67] : memref<1x6x16x16xf32, #tpu.memory_space<vmem>>, vector<1x1x16x16xf32>
    %86 = vector.shape_cast %85 : vector<1x1x16x16xf32> to vector<16x16xf32>
    %87 = vector.shape_cast %81 : vector<16x16xf32> to vector<1x1x16x16xf32>
    tpu.vector_store %arg8[%c0_64, %c0_65, %c0_66, %c0_67], %87 {strides = array<i32>} : memref<1x6x16x16xf32, #tpu.memory_space<vmem>>, vector<1x1x16x16xf32>,
    %c1_68 = arith.constant 1 : index
    %c0_69 = arith.constant 0 : index
    %c0_70 = arith.constant 0 : index
    %c0_71 = arith.constant 0 : index
    %88 = vector.load %arg5[%c1_68, %c0_69, %c0_70, %c0_71] : memref<6x4x16x1xf32, #tpu.memory_space<vmem>>, vector<1x1x16x1xf32>
    %89 = vector.shape_cast %88 : vector<1x1x16x1xf32> to vector<16x1xf32>
    %c1_72 = arith.constant 1 : index
    %c0_73 = arith.constant 0 : index
    %c0_74 = arith.constant 0 : index
    %c0_75 = arith.constant 0 : index
    %90 = vector.load %arg6[%c1_72, %c0_73, %c0_74, %c0_75] : memref<6x4x16x1xf32, #tpu.memory_space<vmem>>, vector<1x1x16x1xf32>
    %91 = vector.shape_cast %90 : vector<1x1x16x1xf32> to vector<16x1xf32>
    %92 = arith.subf %89, %91 : vector<16x1xf32>
    %93 = vector.broadcast %92 : vector<16x1xf32> to vector<16x16xf32>
    %94 = arith.mulf %93, %1 : vector<16x16xf32>
    %95 = vector.broadcast %89 : vector<16x1xf32> to vector<16x16xf32>
    %96 = arith.mulf %95, %5 : vector<16x16xf32>
    %97 = vector.broadcast %91 : vector<16x1xf32> to vector<16x16xf32>
    %98 = arith.mulf %97, %4 : vector<16x16xf32>
    %99 = arith.addf %94, %98 : vector<16x16xf32>
    %100 = arith.addf %94, %96 : vector<16x16xf32>
    %c1_76 = arith.constant 1 : index
    %c1_77 = arith.constant 1 : index
    %c0_78 = arith.constant 0 : index
    %c0_79 = arith.constant 0 : index
    %101 = vector.load %arg5[%c1_76, %c1_77, %c0_78, %c0_79] : memref<6x4x16x1xf32, #tpu.memory_space<vmem>>, vector<1x1x16x1xf32>
    %102 = vector.shape_cast %101 : vector<1x1x16x1xf32> to vector<16x1xf32>
    %c1_80 = arith.constant 1 : index
    %c1_81 = arith.constant 1 : index
    %c0_82 = arith.constant 0 : index
    %c0_83 = arith.constant 0 : index
    %103 = vector.load %arg6[%c1_80, %c1_81, %c0_82, %c0_83] : memref<6x4x16x1xf32, #tpu.memory_space<vmem>>, vector<1x1x16x1xf32>
    %104 = vector.shape_cast %103 : vector<1x1x16x1xf32> to vector<16x1xf32>
    %105 = arith.subf %102, %104 : vector<16x1xf32>
    %106 = vector.broadcast %105 : vector<16x1xf32> to vector<16x16xf32>
    %107 = arith.mulf %106, %7 : vector<16x16xf32>
    %108 = vector.broadcast %102 : vector<16x1xf32> to vector<16x16xf32>
    %109 = arith.mulf %108, %11 : vector<16x16xf32>
    %110 = vector.broadcast %104 : vector<16x1xf32> to vector<16x16xf32>
    %111 = arith.mulf %110, %10 : vector<16x16xf32>
    %112 = arith.addf %107, %111 : vector<16x16xf32>
    %113 = arith.addf %99, %112 : vector<16x16xf32>
    %114 = arith.addf %107, %109 : vector<16x16xf32>
    %115 = arith.addf %100, %114 : vector<16x16xf32>
    %c1_84 = arith.constant 1 : index
    %c2_85 = arith.constant 2 : index
    %c0_86 = arith.constant 0 : index
    %c0_87 = arith.constant 0 : index
    %116 = vector.load %arg5[%c1_84, %c2_85, %c0_86, %c0_87] : memref<6x4x16x1xf32, #tpu.memory_space<vmem>>, vector<1x1x16x1xf32>
    %117 = vector.shape_cast %116 : vector<1x1x16x1xf32> to vector<16x1xf32>
    %c1_88 = arith.constant 1 : index
    %c2_89 = arith.constant 2 : index
    %c0_90 = arith.constant 0 : index
    %c0_91 = arith.constant 0 : index
    %118 = vector.load %arg6[%c1_88, %c2_89, %c0_90, %c0_91] : memref<6x4x16x1xf32, #tpu.memory_space<vmem>>, vector<1x1x16x1xf32>
    %119 = vector.shape_cast %118 : vector<1x1x16x1xf32> to vector<16x1xf32>
    %120 = arith.subf %117, %119 : vector<16x1xf32>
    %121 = vector.broadcast %120 : vector<16x1xf32> to vector<16x16xf32>
    %122 = arith.mulf %121, %13 : vector<16x16xf32>
    %123 = vector.broadcast %117 : vector<16x1xf32> to vector<16x16xf32>
    %124 = arith.mulf %123, %17 : vector<16x16xf32>
    %125 = vector.broadcast %119 : vector<16x1xf32> to vector<16x16xf32>
    %126 = arith.mulf %125, %16 : vector<16x16xf32>
    %127 = arith.addf %122, %126 : vector<16x16xf32>
    %128 = arith.addf %113, %127 : vector<16x16xf32>
    %129 = arith.addf %122, %124 : vector<16x16xf32>
    %130 = arith.addf %115, %129 : vector<16x16xf32>
    %c1_92 = arith.constant 1 : index
    %c3_93 = arith.constant 3 : index
    %c0_94 = arith.constant 0 : index
    %c0_95 = arith.constant 0 : index
    %131 = vector.load %arg5[%c1_92, %c3_93, %c0_94, %c0_95] : memref<6x4x16x1xf32, #tpu.memory_space<vmem>>, vector<1x1x16x1xf32>
    %132 = vector.shape_cast %131 : vector<1x1x16x1xf32> to vector<16x1xf32>
    %c1_96 = arith.constant 1 : index
    %c3_97 = arith.constant 3 : index
    %c0_98 = arith.constant 0 : index
    %c0_99 = arith.constant 0 : index
    %133 = vector.load %arg6[%c1_96, %c3_97, %c0_98, %c0_99] : memref<6x4x16x1xf32, #tpu.memory_space<vmem>>, vector<1x1x16x1xf32>
    %134 = vector.shape_cast %133 : vector<1x1x16x1xf32> to vector<16x1xf32>
    %135 = arith.subf %132, %134 : vector<16x1xf32>
    %136 = vector.broadcast %135 : vector<16x1xf32> to vector<16x16xf32>
    %137 = arith.mulf %136, %19 : vector<16x16xf32>
    %138 = vector.broadcast %132 : vector<16x1xf32> to vector<16x16xf32>
    %139 = arith.mulf %138, %23 : vector<16x16xf32>
    %140 = vector.broadcast %134 : vector<16x1xf32> to vector<16x16xf32>
    %141 = arith.mulf %140, %22 : vector<16x16xf32>
    %142 = arith.addf %137, %141 : vector<16x16xf32>
    %143 = arith.addf %128, %142 : vector<16x16xf32>
    %144 = arith.addf %137, %139 : vector<16x16xf32>
    %145 = arith.addf %130, %144 : vector<16x16xf32>
    %c0_100 = arith.constant 0 : index
    %c1_101 = arith.constant 1 : index
    %c0_102 = arith.constant 0 : index
    %c0_103 = arith.constant 0 : index
    %146 = vector.load %arg7[%c0_100, %c1_101, %c0_102, %c0_103] : memref<1x6x16x16xf32, #tpu.memory_space<vmem>>, vector<1x1x16x16xf32>
    %147 = vector.shape_cast %146 : vector<1x1x16x16xf32> to vector<16x16xf32>
    %148 = vector.shape_cast %143 : vector<16x16xf32> to vector<1x1x16x16xf32>
    tpu.vector_store %arg7[%c0_100, %c1_101, %c0_102, %c0_103], %148 {strides = array<i32>} : memref<1x6x16x16xf32, #tpu.memory_space<vmem>>, vector<1x1x16x16xf32>,
    %c0_104 = arith.constant 0 : index
    %c1_105 = arith.constant 1 : index
    %c0_106 = arith.constant 0 : index
    %c0_107 = arith.constant 0 : index
    %149 = vector.load %arg8[%c0_104, %c1_105, %c0_106, %c0_107] : memref<1x6x16x16xf32, #tpu.memory_space<vmem>>, vector<1x1x16x16xf32>
    %150 = vector.shape_cast %149 : vector<1x1x16x16xf32> to vector<16x16xf32>
    %151 = vector.shape_cast %145 : vector<16x16xf32> to vector<1x1x16x16xf32>
    tpu.vector_store %arg8[%c0_104, %c1_105, %c0_106, %c0_107], %151 {strides = array<i32>} : memref<1x6x16x16xf32, #tpu.memory_space<vmem>>, vector<1x1x16x16xf32>,
    %c2_108 = arith.constant 2 : index
    %c0_109 = arith.constant 0 : index
    %c0_110 = arith.constant 0 : index
    %c0_111 = arith.constant 0 : index
    %152 = vector.load %arg5[%c2_108, %c0_109, %c0_110, %c0_111] : memref<6x4x16x1xf32, #tpu.memory_space<vmem>>, vector<1x1x16x1xf32>
    %153 = vector.shape_cast %152 : vector<1x1x16x1xf32> to vector<16x1xf32>
    %c2_112 = arith.constant 2 : index
    %c0_113 = arith.constant 0 : index
    %c0_114 = arith.constant 0 : index
    %c0_115 = arith.constant 0 : index
    %154 = vector.load %arg6[%c2_112, %c0_113, %c0_114, %c0_115] : memref<6x4x16x1xf32, #tpu.memory_space<vmem>>, vector<1x1x16x1xf32>
    %155 = vector.shape_cast %154 : vector<1x1x16x1xf32> to vector<16x1xf32>
    %156 = arith.subf %153, %155 : vector<16x1xf32>
    %157 = vector.broadcast %156 : vector<16x1xf32> to vector<16x16xf32>
    %158 = arith.mulf %157, %1 : vector<16x16xf32>
    %159 = vector.broadcast %153 : vector<16x1xf32> to vector<16x16xf32>
    %160 = arith.mulf %159, %5 : vector<16x16xf32>
    %161 = vector.broadcast %155 : vector<16x1xf32> to vector<16x16xf32>
    %162 = arith.mulf %161, %4 : vector<16x16xf32>
    %163 = arith.addf %158, %162 : vector<16x16xf32>
    %164 = arith.addf %158, %160 : vector<16x16xf32>
    %c2_116 = arith.constant 2 : index
    %c1_117 = arith.constant 1 : index
    %c0_118 = arith.constant 0 : index
    %c0_119 = arith.constant 0 : index
    %165 = vector.load %arg5[%c2_116, %c1_117, %c0_118, %c0_119] : memref<6x4x16x1xf32, #tpu.memory_space<vmem>>, vector<1x1x16x1xf32>
    %166 = vector.shape_cast %165 : vector<1x1x16x1xf32> to vector<16x1xf32>
    %c2_120 = arith.constant 2 : index
    %c1_121 = arith.constant 1 : index
    %c0_122 = arith.constant 0 : index
    %c0_123 = arith.constant 0 : index
    %167 = vector.load %arg6[%c2_120, %c1_121, %c0_122, %c0_123] : memref<6x4x16x1xf32, #tpu.memory_space<vmem>>, vector<1x1x16x1xf32>
    %168 = vector.shape_cast %167 : vector<1x1x16x1xf32> to vector<16x1xf32>
    %169 = arith.subf %166, %168 : vector<16x1xf32>
    %170 = vector.broadcast %169 : vector<16x1xf32> to vector<16x16xf32>
    %171 = arith.mulf %170, %7 : vector<16x16xf32>
    %172 = vector.broadcast %166 : vector<16x1xf32> to vector<16x16xf32>
    %173 = arith.mulf %172, %11 : vector<16x16xf32>
    %174 = vector.broadcast %168 : vector<16x1xf32> to vector<16x16xf32>
    %175 = arith.mulf %174, %10 : vector<16x16xf32>
    %176 = arith.addf %171, %175 : vector<16x16xf32>
    %177 = arith.addf %163, %176 : vector<16x16xf32>
    %178 = arith.addf %171, %173 : vector<16x16xf32>
    %179 = arith.addf %164, %178 : vector<16x16xf32>
    %c2_124 = arith.constant 2 : index
    %c2_125 = arith.constant 2 : index
    %c0_126 = arith.constant 0 : index
    %c0_127 = arith.constant 0 : index
    %180 = vector.load %arg5[%c2_124, %c2_125, %c0_126, %c0_127] : memref<6x4x16x1xf32, #tpu.memory_space<vmem>>, vector<1x1x16x1xf32>
    %181 = vector.shape_cast %180 : vector<1x1x16x1xf32> to vector<16x1xf32>
    %c2_128 = arith.constant 2 : index
    %c2_129 = arith.constant 2 : index
    %c0_130 = arith.constant 0 : index
    %c0_131 = arith.constant 0 : index
    %182 = vector.load %arg6[%c2_128, %c2_129, %c0_130, %c0_131] : memref<6x4x16x1xf32, #tpu.memory_space<vmem>>, vector<1x1x16x1xf32>
    %183 = vector.shape_cast %182 : vector<1x1x16x1xf32> to vector<16x1xf32>
    %184 = arith.subf %181, %183 : vector<16x1xf32>
    %185 = vector.broadcast %184 : vector<16x1xf32> to vector<16x16xf32>
    %186 = arith.mulf %185, %13 : vector<16x16xf32>
    %187 = vector.broadcast %181 : vector<16x1xf32> to vector<16x16xf32>
    %188 = arith.mulf %187, %17 : vector<16x16xf32>
    %189 = vector.broadcast %183 : vector<16x1xf32> to vector<16x16xf32>
    %190 = arith.mulf %189, %16 : vector<16x16xf32>
    %191 = arith.addf %186, %190 : vector<16x16xf32>
    %192 = arith.addf %177, %191 : vector<16x16xf32>
    %193 = arith.addf %186, %188 : vector<16x16xf32>
    %194 = arith.addf %179, %193 : vector<16x16xf32>
    %c2_132 = arith.constant 2 : index
    %c3_133 = arith.constant 3 : index
    %c0_134 = arith.constant 0 : index
    %c0_135 = arith.constant 0 : index
    %195 = vector.load %arg5[%c2_132, %c3_133, %c0_134, %c0_135] : memref<6x4x16x1xf32, #tpu.memory_space<vmem>>, vector<1x1x16x1xf32>
    %196 = vector.shape_cast %195 : vector<1x1x16x1xf32> to vector<16x1xf32>
    %c2_136 = arith.constant 2 : index
    %c3_137 = arith.constant 3 : index
    %c0_138 = arith.constant 0 : index
    %c0_139 = arith.constant 0 : index
    %197 = vector.load %arg6[%c2_136, %c3_137, %c0_138, %c0_139] : memref<6x4x16x1xf32, #tpu.memory_space<vmem>>, vector<1x1x16x1xf32>
    %198 = vector.shape_cast %197 : vector<1x1x16x1xf32> to vector<16x1xf32>
    %199 = arith.subf %196, %198 : vector<16x1xf32>
    %200 = vector.broadcast %199 : vector<16x1xf32> to vector<16x16xf32>
    %201 = arith.mulf %200, %19 : vector<16x16xf32>
    %202 = vector.broadcast %196 : vector<16x1xf32> to vector<16x16xf32>
    %203 = arith.mulf %202, %23 : vector<16x16xf32>
    %204 = vector.broadcast %198 : vector<16x1xf32> to vector<16x16xf32>
    %205 = arith.mulf %204, %22 : vector<16x16xf32>
    %206 = arith.addf %201, %205 : vector<16x16xf32>
    %207 = arith.addf %192, %206 : vector<16x16xf32>
    %208 = arith.addf %201, %203 : vector<16x16xf32>
    %209 = arith.addf %194, %208 : vector<16x16xf32>
    %c0_140 = arith.constant 0 : index
    %c2_141 = arith.constant 2 : index
    %c0_142 = arith.constant 0 : index
    %c0_143 = arith.constant 0 : index
    %210 = vector.load %arg7[%c0_140, %c2_141, %c0_142, %c0_143] : memref<1x6x16x16xf32, #tpu.memory_space<vmem>>, vector<1x1x16x16xf32>
    %211 = vector.shape_cast %210 : vector<1x1x16x16xf32> to vector<16x16xf32>
    %212 = vector.shape_cast %207 : vector<16x16xf32> to vector<1x1x16x16xf32>
    tpu.vector_store %arg7[%c0_140, %c2_141, %c0_142, %c0_143], %212 {strides = array<i32>} : memref<1x6x16x16xf32, #tpu.memory_space<vmem>>, vector<1x1x16x16xf32>,
    %c0_144 = arith.constant 0 : index
    %c2_145 = arith.constant 2 : index
    %c0_146 = arith.constant 0 : index
    %c0_147 = arith.constant 0 : index
    %213 = vector.load %arg8[%c0_144, %c2_145, %c0_146, %c0_147] : memref<1x6x16x16xf32, #tpu.memory_space<vmem>>, vector<1x1x16x16xf32>
    %214 = vector.shape_cast %213 : vector<1x1x16x16xf32> to vector<16x16xf32>
    %215 = vector.shape_cast %209 : vector<16x16xf32> to vector<1x1x16x16xf32>
    tpu.vector_store %arg8[%c0_144, %c2_145, %c0_146, %c0_147], %215 {strides = array<i32>} : memref<1x6x16x16xf32, #tpu.memory_space<vmem>>, vector<1x1x16x16xf32>,
    %c3_148 = arith.constant 3 : index
    %c0_149 = arith.constant 0 : index
    %c0_150 = arith.constant 0 : index
    %c0_151 = arith.constant 0 : index
    %216 = vector.load %arg5[%c3_148, %c0_149, %c0_150, %c0_151] : memref<6x4x16x1xf32, #tpu.memory_space<vmem>>, vector<1x1x16x1xf32>
    %217 = vector.shape_cast %216 : vector<1x1x16x1xf32> to vector<16x1xf32>
    %c3_152 = arith.constant 3 : index
    %c0_153 = arith.constant 0 : index
    %c0_154 = arith.constant 0 : index
    %c0_155 = arith.constant 0 : index
    %218 = vector.load %arg6[%c3_152, %c0_153, %c0_154, %c0_155] : memref<6x4x16x1xf32, #tpu.memory_space<vmem>>, vector<1x1x16x1xf32>
    %219 = vector.shape_cast %218 : vector<1x1x16x1xf32> to vector<16x1xf32>
    %220 = arith.subf %217, %219 : vector<16x1xf32>
    %221 = vector.broadcast %220 : vector<16x1xf32> to vector<16x16xf32>
    %222 = arith.mulf %221, %1 : vector<16x16xf32>
    %223 = vector.broadcast %217 : vector<16x1xf32> to vector<16x16xf32>
    %224 = arith.mulf %223, %5 : vector<16x16xf32>
    %225 = vector.broadcast %219 : vector<16x1xf32> to vector<16x16xf32>
    %226 = arith.mulf %225, %4 : vector<16x16xf32>
    %227 = arith.addf %222, %226 : vector<16x16xf32>
    %228 = arith.addf %222, %224 : vector<16x16xf32>
    %c3_156 = arith.constant 3 : index
    %c1_157 = arith.constant 1 : index
    %c0_158 = arith.constant 0 : index
    %c0_159 = arith.constant 0 : index
    %229 = vector.load %arg5[%c3_156, %c1_157, %c0_158, %c0_159] : memref<6x4x16x1xf32, #tpu.memory_space<vmem>>, vector<1x1x16x1xf32>
    %230 = vector.shape_cast %229 : vector<1x1x16x1xf32> to vector<16x1xf32>
    %c3_160 = arith.constant 3 : index
    %c1_161 = arith.constant 1 : index
    %c0_162 = arith.constant 0 : index
    %c0_163 = arith.constant 0 : index
    %231 = vector.load %arg6[%c3_160, %c1_161, %c0_162, %c0_163] : memref<6x4x16x1xf32, #tpu.memory_space<vmem>>, vector<1x1x16x1xf32>
    %232 = vector.shape_cast %231 : vector<1x1x16x1xf32> to vector<16x1xf32>
    %233 = arith.subf %230, %232 : vector<16x1xf32>
    %234 = vector.broadcast %233 : vector<16x1xf32> to vector<16x16xf32>
    %235 = arith.mulf %234, %7 : vector<16x16xf32>
    %236 = vector.broadcast %230 : vector<16x1xf32> to vector<16x16xf32>
    %237 = arith.mulf %236, %11 : vector<16x16xf32>
    %238 = vector.broadcast %232 : vector<16x1xf32> to vector<16x16xf32>
    %239 = arith.mulf %238, %10 : vector<16x16xf32>
    %240 = arith.addf %235, %239 : vector<16x16xf32>
    %241 = arith.addf %227, %240 : vector<16x16xf32>
    %242 = arith.addf %235, %237 : vector<16x16xf32>
    %243 = arith.addf %228, %242 : vector<16x16xf32>
    %c3_164 = arith.constant 3 : index
    %c2_165 = arith.constant 2 : index
    %c0_166 = arith.constant 0 : index
    %c0_167 = arith.constant 0 : index
    %244 = vector.load %arg5[%c3_164, %c2_165, %c0_166, %c0_167] : memref<6x4x16x1xf32, #tpu.memory_space<vmem>>, vector<1x1x16x1xf32>
    %245 = vector.shape_cast %244 : vector<1x1x16x1xf32> to vector<16x1xf32>
    %c3_168 = arith.constant 3 : index
    %c2_169 = arith.constant 2 : index
    %c0_170 = arith.constant 0 : index
    %c0_171 = arith.constant 0 : index
    %246 = vector.load %arg6[%c3_168, %c2_169, %c0_170, %c0_171] : memref<6x4x16x1xf32, #tpu.memory_space<vmem>>, vector<1x1x16x1xf32>
    %247 = vector.shape_cast %246 : vector<1x1x16x1xf32> to vector<16x1xf32>
    %248 = arith.subf %245, %247 : vector<16x1xf32>
    %249 = vector.broadcast %248 : vector<16x1xf32> to vector<16x16xf32>
    %250 = arith.mulf %249, %13 : vector<16x16xf32>
    %251 = vector.broadcast %245 : vector<16x1xf32> to vector<16x16xf32>
    %252 = arith.mulf %251, %17 : vector<16x16xf32>
    %253 = vector.broadcast %247 : vector<16x1xf32> to vector<16x16xf32>
    %254 = arith.mulf %253, %16 : vector<16x16xf32>
    %255 = arith.addf %250, %254 : vector<16x16xf32>
    %256 = arith.addf %241, %255 : vector<16x16xf32>
    %257 = arith.addf %250, %252 : vector<16x16xf32>
    %258 = arith.addf %243, %257 : vector<16x16xf32>
    %c3_172 = arith.constant 3 : index
    %c3_173 = arith.constant 3 : index
    %c0_174 = arith.constant 0 : index
    %c0_175 = arith.constant 0 : index
    %259 = vector.load %arg5[%c3_172, %c3_173, %c0_174, %c0_175] : memref<6x4x16x1xf32, #tpu.memory_space<vmem>>, vector<1x1x16x1xf32>
    %260 = vector.shape_cast %259 : vector<1x1x16x1xf32> to vector<16x1xf32>
    %c3_176 = arith.constant 3 : index
    %c3_177 = arith.constant 3 : index
    %c0_178 = arith.constant 0 : index
    %c0_179 = arith.constant 0 : index
    %261 = vector.load %arg6[%c3_176, %c3_177, %c0_178, %c0_179] : memref<6x4x16x1xf32, #tpu.memory_space<vmem>>, vector<1x1x16x1xf32>
    %262 = vector.shape_cast %261 : vector<1x1x16x1xf32> to vector<16x1xf32>
    %263 = arith.subf %260, %262 : vector<16x1xf32>
    %264 = vector.broadcast %263 : vector<16x1xf32> to vector<16x16xf32>
    %265 = arith.mulf %264, %19 : vector<16x16xf32>
    %266 = vector.broadcast %260 : vector<16x1xf32> to vector<16x16xf32>
    %267 = arith.mulf %266, %23 : vector<16x16xf32>
    %268 = vector.broadcast %262 : vector<16x1xf32> to vector<16x16xf32>
    %269 = arith.mulf %268, %22 : vector<16x16xf32>
    %270 = arith.addf %265, %269 : vector<16x16xf32>
    %271 = arith.addf %256, %270 : vector<16x16xf32>
    %272 = arith.addf %265, %267 : vector<16x16xf32>
    %273 = arith.addf %258, %272 : vector<16x16xf32>
    %c0_180 = arith.constant 0 : index
    %c3_181 = arith.constant 3 : index
    %c0_182 = arith.constant 0 : index
    %c0_183 = arith.constant 0 : index
    %274 = vector.load %arg7[%c0_180, %c3_181, %c0_182, %c0_183] : memref<1x6x16x16xf32, #tpu.memory_space<vmem>>, vector<1x1x16x16xf32>
    %275 = vector.shape_cast %274 : vector<1x1x16x16xf32> to vector<16x16xf32>
    %276 = vector.shape_cast %271 : vector<16x16xf32> to vector<1x1x16x16xf32>
    tpu.vector_store %arg7[%c0_180, %c3_181, %c0_182, %c0_183], %276 {strides = array<i32>} : memref<1x6x16x16xf32, #tpu.memory_space<vmem>>, vector<1x1x16x16xf32>,
    %c0_184 = arith.constant 0 : index
    %c3_185 = arith.constant 3 : index
    %c0_186 = arith.constant 0 : index
    %c0_187 = arith.constant 0 : index
    %277 = vector.load %arg8[%c0_184, %c3_185, %c0_186, %c0_187] : memref<1x6x16x16xf32, #tpu.memory_space<vmem>>, vector<1x1x16x16xf32>
    %278 = vector.shape_cast %277 : vector<1x1x16x16xf32> to vector<16x16xf32>
    %279 = vector.shape_cast %273 : vector<16x16xf32> to vector<1x1x16x16xf32>
    tpu.vector_store %arg8[%c0_184, %c3_185, %c0_186, %c0_187], %279 {strides = array<i32>} : memref<1x6x16x16xf32, #tpu.memory_space<vmem>>, vector<1x1x16x16xf32>,
    %c4 = arith.constant 4 : index
    %c0_188 = arith.constant 0 : index
    %c0_189 = arith.constant 0 : index
    %c0_190 = arith.constant 0 : index
    %280 = vector.load %arg5[%c4, %c0_188, %c0_189, %c0_190] : memref<6x4x16x1xf32, #tpu.memory_space<vmem>>, vector<1x1x16x1xf32>
    %281 = vector.shape_cast %280 : vector<1x1x16x1xf32> to vector<16x1xf32>
    %c4_191 = arith.constant 4 : index
    %c0_192 = arith.constant 0 : index
    %c0_193 = arith.constant 0 : index
    %c0_194 = arith.constant 0 : index
    %282 = vector.load %arg6[%c4_191, %c0_192, %c0_193, %c0_194] : memref<6x4x16x1xf32, #tpu.memory_space<vmem>>, vector<1x1x16x1xf32>
    %283 = vector.shape_cast %282 : vector<1x1x16x1xf32> to vector<16x1xf32>
    %284 = arith.subf %281, %283 : vector<16x1xf32>
    %285 = vector.broadcast %284 : vector<16x1xf32> to vector<16x16xf32>
    %286 = arith.mulf %285, %1 : vector<16x16xf32>
    %287 = vector.broadcast %281 : vector<16x1xf32> to vector<16x16xf32>
    %288 = arith.mulf %287, %5 : vector<16x16xf32>
    %289 = vector.broadcast %283 : vector<16x1xf32> to vector<16x16xf32>
    %290 = arith.mulf %289, %4 : vector<16x16xf32>
    %291 = arith.addf %286, %290 : vector<16x16xf32>
    %292 = arith.addf %286, %288 : vector<16x16xf32>
    %c4_195 = arith.constant 4 : index
    %c1_196 = arith.constant 1 : index
    %c0_197 = arith.constant 0 : index
    %c0_198 = arith.constant 0 : index
    %293 = vector.load %arg5[%c4_195, %c1_196, %c0_197, %c0_198] : memref<6x4x16x1xf32, #tpu.memory_space<vmem>>, vector<1x1x16x1xf32>
    %294 = vector.shape_cast %293 : vector<1x1x16x1xf32> to vector<16x1xf32>
    %c4_199 = arith.constant 4 : index
    %c1_200 = arith.constant 1 : index
    %c0_201 = arith.constant 0 : index
    %c0_202 = arith.constant 0 : index
    %295 = vector.load %arg6[%c4_199, %c1_200, %c0_201, %c0_202] : memref<6x4x16x1xf32, #tpu.memory_space<vmem>>, vector<1x1x16x1xf32>
    %296 = vector.shape_cast %295 : vector<1x1x16x1xf32> to vector<16x1xf32>
    %297 = arith.subf %294, %296 : vector<16x1xf32>
    %298 = vector.broadcast %297 : vector<16x1xf32> to vector<16x16xf32>
    %299 = arith.mulf %298, %7 : vector<16x16xf32>
    %300 = vector.broadcast %294 : vector<16x1xf32> to vector<16x16xf32>
    %301 = arith.mulf %300, %11 : vector<16x16xf32>
    %302 = vector.broadcast %296 : vector<16x1xf32> to vector<16x16xf32>
    %303 = arith.mulf %302, %10 : vector<16x16xf32>
    %304 = arith.addf %299, %303 : vector<16x16xf32>
    %305 = arith.addf %291, %304 : vector<16x16xf32>
    %306 = arith.addf %299, %301 : vector<16x16xf32>
    %307 = arith.addf %292, %306 : vector<16x16xf32>
    %c4_203 = arith.constant 4 : index
    %c2_204 = arith.constant 2 : index
    %c0_205 = arith.constant 0 : index
    %c0_206 = arith.constant 0 : index
    %308 = vector.load %arg5[%c4_203, %c2_204, %c0_205, %c0_206] : memref<6x4x16x1xf32, #tpu.memory_space<vmem>>, vector<1x1x16x1xf32>
    %309 = vector.shape_cast %308 : vector<1x1x16x1xf32> to vector<16x1xf32>
    %c4_207 = arith.constant 4 : index
    %c2_208 = arith.constant 2 : index
    %c0_209 = arith.constant 0 : index
    %c0_210 = arith.constant 0 : index
    %310 = vector.load %arg6[%c4_207, %c2_208, %c0_209, %c0_210] : memref<6x4x16x1xf32, #tpu.memory_space<vmem>>, vector<1x1x16x1xf32>
    %311 = vector.shape_cast %310 : vector<1x1x16x1xf32> to vector<16x1xf32>
    %312 = arith.subf %309, %311 : vector<16x1xf32>
    %313 = vector.broadcast %312 : vector<16x1xf32> to vector<16x16xf32>
    %314 = arith.mulf %313, %13 : vector<16x16xf32>
    %315 = vector.broadcast %309 : vector<16x1xf32> to vector<16x16xf32>
    %316 = arith.mulf %315, %17 : vector<16x16xf32>
    %317 = vector.broadcast %311 : vector<16x1xf32> to vector<16x16xf32>
    %318 = arith.mulf %317, %16 : vector<16x16xf32>
    %319 = arith.addf %314, %318 : vector<16x16xf32>
    %320 = arith.addf %305, %319 : vector<16x16xf32>
    %321 = arith.addf %314, %316 : vector<16x16xf32>
    %322 = arith.addf %307, %321 : vector<16x16xf32>
    %c4_211 = arith.constant 4 : index
    %c3_212 = arith.constant 3 : index
    %c0_213 = arith.constant 0 : index
    %c0_214 = arith.constant 0 : index
    %323 = vector.load %arg5[%c4_211, %c3_212, %c0_213, %c0_214] : memref<6x4x16x1xf32, #tpu.memory_space<vmem>>, vector<1x1x16x1xf32>
    %324 = vector.shape_cast %323 : vector<1x1x16x1xf32> to vector<16x1xf32>
    %c4_215 = arith.constant 4 : index
    %c3_216 = arith.constant 3 : index
    %c0_217 = arith.constant 0 : index
    %c0_218 = arith.constant 0 : index
    %325 = vector.load %arg6[%c4_215, %c3_216, %c0_217, %c0_218] : memref<6x4x16x1xf32, #tpu.memory_space<vmem>>, vector<1x1x16x1xf32>
    %326 = vector.shape_cast %325 : vector<1x1x16x1xf32> to vector<16x1xf32>
    %327 = arith.subf %324, %326 : vector<16x1xf32>
    %328 = vector.broadcast %327 : vector<16x1xf32> to vector<16x16xf32>
    %329 = arith.mulf %328, %19 : vector<16x16xf32>
    %330 = vector.broadcast %324 : vector<16x1xf32> to vector<16x16xf32>
    %331 = arith.mulf %330, %23 : vector<16x16xf32>
    %332 = vector.broadcast %326 : vector<16x1xf32> to vector<16x16xf32>
    %333 = arith.mulf %332, %22 : vector<16x16xf32>
    %334 = arith.addf %329, %333 : vector<16x16xf32>
    %335 = arith.addf %320, %334 : vector<16x16xf32>
    %336 = arith.addf %329, %331 : vector<16x16xf32>
    %337 = arith.addf %322, %336 : vector<16x16xf32>
    %c0_219 = arith.constant 0 : index
    %c4_220 = arith.constant 4 : index
    %c0_221 = arith.constant 0 : index
    %c0_222 = arith.constant 0 : index
    %338 = vector.load %arg7[%c0_219, %c4_220, %c0_221, %c0_222] : memref<1x6x16x16xf32, #tpu.memory_space<vmem>>, vector<1x1x16x16xf32>
    %339 = vector.shape_cast %338 : vector<1x1x16x16xf32> to vector<16x16xf32>
    %340 = vector.shape_cast %335 : vector<16x16xf32> to vector<1x1x16x16xf32>
    tpu.vector_store %arg7[%c0_219, %c4_220, %c0_221, %c0_222], %340 {strides = array<i32>} : memref<1x6x16x16xf32, #tpu.memory_space<vmem>>, vector<1x1x16x16xf32>,
    %c0_223 = arith.constant 0 : index
    %c4_224 = arith.constant 4 : index
    %c0_225 = arith.constant 0 : index
    %c0_226 = arith.constant 0 : index
    %341 = vector.load %arg8[%c0_223, %c4_224, %c0_225, %c0_226] : memref<1x6x16x16xf32, #tpu.memory_space<vmem>>, vector<1x1x16x16xf32>
    %342 = vector.shape_cast %341 : vector<1x1x16x16xf32> to vector<16x16xf32>
    %343 = vector.shape_cast %337 : vector<16x16xf32> to vector<1x1x16x16xf32>
    tpu.vector_store %arg8[%c0_223, %c4_224, %c0_225, %c0_226], %343 {strides = array<i32>} : memref<1x6x16x16xf32, #tpu.memory_space<vmem>>, vector<1x1x16x16xf32>,
    %c5 = arith.constant 5 : index
    %c0_227 = arith.constant 0 : index
    %c0_228 = arith.constant 0 : index
    %c0_229 = arith.constant 0 : index
    %344 = vector.load %arg5[%c5, %c0_227, %c0_228, %c0_229] : memref<6x4x16x1xf32, #tpu.memory_space<vmem>>, vector<1x1x16x1xf32>
    %345 = vector.shape_cast %344 : vector<1x1x16x1xf32> to vector<16x1xf32>
    %c5_230 = arith.constant 5 : index
    %c0_231 = arith.constant 0 : index
    %c0_232 = arith.constant 0 : index
    %c0_233 = arith.constant 0 : index
    %346 = vector.load %arg6[%c5_230, %c0_231, %c0_232, %c0_233] : memref<6x4x16x1xf32, #tpu.memory_space<vmem>>, vector<1x1x16x1xf32>
    %347 = vector.shape_cast %346 : vector<1x1x16x1xf32> to vector<16x1xf32>
    %348 = arith.subf %345, %347 : vector<16x1xf32>
    %349 = vector.broadcast %348 : vector<16x1xf32> to vector<16x16xf32>
    %350 = arith.mulf %349, %1 : vector<16x16xf32>
    %351 = vector.broadcast %345 : vector<16x1xf32> to vector<16x16xf32>
    %352 = arith.mulf %351, %5 : vector<16x16xf32>
    %353 = vector.broadcast %347 : vector<16x1xf32> to vector<16x16xf32>
    %354 = arith.mulf %353, %4 : vector<16x16xf32>
    %355 = arith.addf %350, %354 : vector<16x16xf32>
    %356 = arith.addf %350, %352 : vector<16x16xf32>
    %c5_234 = arith.constant 5 : index
    %c1_235 = arith.constant 1 : index
    %c0_236 = arith.constant 0 : index
    %c0_237 = arith.constant 0 : index
    %357 = vector.load %arg5[%c5_234, %c1_235, %c0_236, %c0_237] : memref<6x4x16x1xf32, #tpu.memory_space<vmem>>, vector<1x1x16x1xf32>
    %358 = vector.shape_cast %357 : vector<1x1x16x1xf32> to vector<16x1xf32>
    %c5_238 = arith.constant 5 : index
    %c1_239 = arith.constant 1 : index
    %c0_240 = arith.constant 0 : index
    %c0_241 = arith.constant 0 : index
    %359 = vector.load %arg6[%c5_238, %c1_239, %c0_240, %c0_241] : memref<6x4x16x1xf32, #tpu.memory_space<vmem>>, vector<1x1x16x1xf32>
    %360 = vector.shape_cast %359 : vector<1x1x16x1xf32> to vector<16x1xf32>
    %361 = arith.subf %358, %360 : vector<16x1xf32>
    %362 = vector.broadcast %361 : vector<16x1xf32> to vector<16x16xf32>
    %363 = arith.mulf %362, %7 : vector<16x16xf32>
    %364 = vector.broadcast %358 : vector<16x1xf32> to vector<16x16xf32>
    %365 = arith.mulf %364, %11 : vector<16x16xf32>
    %366 = vector.broadcast %360 : vector<16x1xf32> to vector<16x16xf32>
    %367 = arith.mulf %366, %10 : vector<16x16xf32>
    %368 = arith.addf %363, %367 : vector<16x16xf32>
    %369 = arith.addf %355, %368 : vector<16x16xf32>
    %370 = arith.addf %363, %365 : vector<16x16xf32>
    %371 = arith.addf %356, %370 : vector<16x16xf32>
    %c5_242 = arith.constant 5 : index
    %c2_243 = arith.constant 2 : index
    %c0_244 = arith.constant 0 : index
    %c0_245 = arith.constant 0 : index
    %372 = vector.load %arg5[%c5_242, %c2_243, %c0_244, %c0_245] : memref<6x4x16x1xf32, #tpu.memory_space<vmem>>, vector<1x1x16x1xf32>
    %373 = vector.shape_cast %372 : vector<1x1x16x1xf32> to vector<16x1xf32>
    %c5_246 = arith.constant 5 : index
    %c2_247 = arith.constant 2 : index
    %c0_248 = arith.constant 0 : index
    %c0_249 = arith.constant 0 : index
    %374 = vector.load %arg6[%c5_246, %c2_247, %c0_248, %c0_249] : memref<6x4x16x1xf32, #tpu.memory_space<vmem>>, vector<1x1x16x1xf32>
    %375 = vector.shape_cast %374 : vector<1x1x16x1xf32> to vector<16x1xf32>
    %376 = arith.subf %373, %375 : vector<16x1xf32>
    %377 = vector.broadcast %376 : vector<16x1xf32> to vector<16x16xf32>
    %378 = arith.mulf %377, %13 : vector<16x16xf32>
    %379 = vector.broadcast %373 : vector<16x1xf32> to vector<16x16xf32>
    %380 = arith.mulf %379, %17 : vector<16x16xf32>
    %381 = vector.broadcast %375 : vector<16x1xf32> to vector<16x16xf32>
    %382 = arith.mulf %381, %16 : vector<16x16xf32>
    %383 = arith.addf %378, %382 : vector<16x16xf32>
    %384 = arith.addf %369, %383 : vector<16x16xf32>
    %385 = arith.addf %378, %380 : vector<16x16xf32>
    %386 = arith.addf %371, %385 : vector<16x16xf32>
    %c5_250 = arith.constant 5 : index
    %c3_251 = arith.constant 3 : index
    %c0_252 = arith.constant 0 : index
    %c0_253 = arith.constant 0 : index
    %387 = vector.load %arg5[%c5_250, %c3_251, %c0_252, %c0_253] : memref<6x4x16x1xf32, #tpu.memory_space<vmem>>, vector<1x1x16x1xf32>
    %388 = vector.shape_cast %387 : vector<1x1x16x1xf32> to vector<16x1xf32>
    %c5_254 = arith.constant 5 : index
    %c3_255 = arith.constant 3 : index
    %c0_256 = arith.constant 0 : index
    %c0_257 = arith.constant 0 : index
    %389 = vector.load %arg6[%c5_254, %c3_255, %c0_256, %c0_257] : memref<6x4x16x1xf32, #tpu.memory_space<vmem>>, vector<1x1x16x1xf32>
    %390 = vector.shape_cast %389 : vector<1x1x16x1xf32> to vector<16x1xf32>
    %391 = arith.subf %388, %390 : vector<16x1xf32>
    %392 = vector.broadcast %391 : vector<16x1xf32> to vector<16x16xf32>
    %393 = arith.mulf %392, %19 : vector<16x16xf32>
    %394 = vector.broadcast %388 : vector<16x1xf32> to vector<16x16xf32>
    %395 = arith.mulf %394, %23 : vector<16x16xf32>
    %396 = vector.broadcast %390 : vector<16x1xf32> to vector<16x16xf32>
    %397 = arith.mulf %396, %22 : vector<16x16xf32>
    %398 = arith.addf %393, %397 : vector<16x16xf32>
    %399 = arith.addf %384, %398 : vector<16x16xf32>
    %400 = arith.addf %393, %395 : vector<16x16xf32>
    %401 = arith.addf %386, %400 : vector<16x16xf32>
    %c0_258 = arith.constant 0 : index
    %c5_259 = arith.constant 5 : index
    %c0_260 = arith.constant 0 : index
    %c0_261 = arith.constant 0 : index
    %402 = vector.load %arg7[%c0_258, %c5_259, %c0_260, %c0_261] : memref<1x6x16x16xf32, #tpu.memory_space<vmem>>, vector<1x1x16x16xf32>
    %403 = vector.shape_cast %402 : vector<1x1x16x16xf32> to vector<16x16xf32>
    %404 = vector.shape_cast %399 : vector<16x16xf32> to vector<1x1x16x16xf32>
    tpu.vector_store %arg7[%c0_258, %c5_259, %c0_260, %c0_261], %404 {strides = array<i32>} : memref<1x6x16x16xf32, #tpu.memory_space<vmem>>, vector<1x1x16x16xf32>,
    %c0_262 = arith.constant 0 : index
    %c5_263 = arith.constant 5 : index
    %c0_264 = arith.constant 0 : index
    %c0_265 = arith.constant 0 : index
    %405 = vector.load %arg8[%c0_262, %c5_263, %c0_264, %c0_265] : memref<1x6x16x16xf32, #tpu.memory_space<vmem>>, vector<1x1x16x16xf32>
    %406 = vector.shape_cast %405 : vector<1x1x16x16xf32> to vector<16x16xf32>
    %407 = vector.shape_cast %401 : vector<16x16xf32> to vector<1x1x16x16xf32>
    tpu.vector_store %arg8[%c0_262, %c5_263, %c0_264, %c0_265], %407 {strides = array<i32>} : memref<1x6x16x16xf32, #tpu.memory_space<vmem>>, vector<1x1x16x16xf32>,
    return
  }
  func.func @transform_0(%arg0: i32, %arg1: i32, %arg2: i32) -> (i32, i32, i32, i32) {
    %c0_i32 = arith.constant 0 : i32
    %c0_i32_0 = arith.constant 0 : i32
    return %arg0, %c0_i32, %arg1, %arg2 : i32, i32, i32, i32
  }
  func.func @transform_1(%arg0: i32, %arg1: i32, %arg2: i32) -> (i32, i32, i32, i32) {
    %c0_i32 = arith.constant 0 : i32
    %c0_i32_0 = arith.constant 0 : i32
    return %arg0, %c0_i32, %arg1, %arg2 : i32, i32, i32, i32
  }
  func.func @transform_2(%arg0: i32, %arg1: i32, %arg2: i32) -> (i32, i32, i32, i32) {
    %c0_i32 = arith.constant 0 : i32
    %c0_i32_0 = arith.constant 0 : i32
    %c0_i32_1 = arith.constant 0 : i32
    %c0_i32_2 = arith.constant 0 : i32
    %c0_i32_3 = arith.constant 0 : i32
    return %c0_i32, %c0_i32_0, %c0_i32_1, %c0_i32_2 : i32, i32, i32, i32
  }
  func.func @transform_3(%arg0: i32, %arg1: i32, %arg2: i32) -> (i32, i32, i32, i32) {
    %c0_i32 = arith.constant 0 : i32
    %c0_i32_0 = arith.constant 0 : i32
    %c0_i32_1 = arith.constant 0 : i32
    %c0_i32_2 = arith.constant 0 : i32
    %c0_i32_3 = arith.constant 0 : i32
    return %c0_i32, %c0_i32_0, %c0_i32_1, %c0_i32_2 : i32, i32, i32, i32
  }
  func.func @transform_4(%arg0: i32, %arg1: i32, %arg2: i32) -> (i32, i32, i32, i32) {
    %c0_i32 = arith.constant 0 : i32
    %c0_i32_0 = arith.constant 0 : i32
    return %arg0, %c0_i32, %arg1, %arg2 : i32, i32, i32, i32
  }
  func.func @transform_5(%arg0: i32, %arg1: i32, %arg2: i32) -> (i32, i32, i32, i32) {
    %c0_i32 = arith.constant 0 : i32
    %c0_i32_0 = arith.constant 0 : i32
    return %arg0, %c0_i32, %arg1, %arg2 : i32, i32, i32, i32
  }
}

</mosaic_0001>

<bundles_post_ra>
// kernel: tpu_custom_call.1
= control target key start
LH: loop header
LB: loop body
LE: loop exit
PB: predicated region body
PF: predicated region fallthrough
CT: control target
= control target key end

     0   :  { %11 = vsyncpa [#allocation3], 0  ;;  %s3016_s0 = inlined_call_operand.vmem [shape: f32[2,4,16,16], index: 0, kind: input, shape index: {}]   ;;  %s3017_s1 = inlined_call_operand.vmem [shape: f32[2,4,16,16], index: 1, kind: input, shape index: {}]   ;;  %s3018_s2 = inlined_call_operand.vmem [shape: f32[6,4,16,1], index: 2, kind: input, shape index: {}]   ;;  %s3019_s3 = inlined_call_operand.vmem [shape: f32[6,4,16,1], index: 3, kind: input, shape index: {}]   ;;  %s3020_s4 = inlined_call_operand.hbm [shape: f32[2,6,16,16], index: 4, kind: output, shape index: {0}]   ;;  %s3021_s5 = inlined_call_operand.hbm [shape: f32[2,6,16,16], index: 5, kind: output, shape index: {1}]  }
   0x1   :  { %13 = vsyncpa [#allocation3 + $0x1], 0 }
   0x2   :  { %14 = vsyncpa [#allocation5], 0 }
   0x3   :  { %16 = vsyncpa [#allocation5 + $0x1], 0  ;;  %s2178_s18 = smov 0   ;;  %s2180_s19 = smov 0  }
   0x4   :  { %s2182_s20 = smov 0   ;;  %s2184_s21 = smov 0  }
   0x5   :  { %s2186_s22 = smov 0   ;;  %s2188_s23 = smov 0  }
   0x6 LB: > { %s1816_s24 = sadd.s32 4294967295, %s2141_s23   ;;  %s1817_s25 = sadd.s32 4294967294, %s2141_s23   ;;  %s2141_s23 = sphi %s2188_s23, %s22_s23   ;;  %s2137_s22 = sphi %s2186_s22, %s3034_s22   ;;  %s2133_s21 = sphi %s2184_s21, %s3033_s21   ;;  %s2129_s20 = sphi %s2182_s20, %s3032_s20   ;;  %s2125_s19 = sphi %s2180_s19, %s3031_s19   ;;  %s2121_s18 = sphi %s2178_s18, %s3030_s18  }
   0x7   : > { %s41_s26 = sadd.s32 1, %s2137_s22  ;;  %s154_s27 = sadd.s32 1, %s2129_s20 }
   0x8   : > { %p43_p0 = scmp.ge.s32.totalorder %s41_s26, 2  ;;  %p164_p1 = scmp.ne.s32.totalorder %s2129_s20, %s2125_s19 }
   0x9   : > { %p165_p2 = scmp.eq.s32.totalorder %s1816_s24, 1  ;;  %p170_p3 = scmp.ne.s32.totalorder %s2125_s19, %s2121_s18 }
   0xa   : > { %s3036_s26 = smov (%p43_p0, %s41_s26), 0  ;;  %p171_p5 = scmp.eq.s32.totalorder %s1817_s25, 1 }
   0xb   : > { %p2218_p4 = por %p165_p2, %p164_p1  ;;  %s147_s29 = ssub.s32 %s2137_s22, %s3036_s26 }
   0xc   : > { %p1820_p6 = scmp.ge.s32.totalorder %s2141_s23, 1  ;;  %p152_p7 = scmp.eq.s32.totalorder %s147_s29, 0 }
   0xd   : > { %p2225_p8 = por %p171_p5, %p170_p3  ;;  %p257_p9 = scmp.lt.s32.totalorder %s2141_s23, 3 }
   0xe   : > { %s2231_s6 = scalar_select %p152_p7, %s2129_s20, %s154_s27  }
   0xf   : > { %p258_p10 = pnand %p1820_p6, %p257_p9 }
  0x11   : > { %261 = sbr.rel (%p258_p10) target bundleno = 480 (0x1e0), region = 36 }
  0x18   : > { %v375_v0 = vld [vmem:[%s3018_s2] sm:$0xff]  ;;  %v376_v2 = vld [vmem:[%s3018_s2 + $0x8] sm:$0xff]  ;;  %v2143_v3 = vmov 0   ;;  %v1838_v7 = vld [vmem:[%s3018_s2 + $0x18] sm:$0xff]  ;;  %p310_p11 = scmp.lt.s32.totalorder %s2133_s21, 1  ;;  %vm577_vm0 = vcmask 130048  }
  0x19   : > { %v377_v1 = vld [vmem:[%s3019_s3] sm:$0xff]  ;;  %2022 = vset.pattern.permute.xlu1 %v2143_v3  ;;  %2021 = vset.pattern.permute.xlu0 %v2143_v3  ;;  %v378_v5 = vld [vmem:[%s3019_s3 + $0x8] sm:$0xff]  ;;  %v1840_v8 = vld [vmem:[%s3019_s3 + $0x18] sm:$0xff]  ;;  %s2563_s16 = sand.u32 1, %s2125_s19   ;;  %s1956_s10 = smul.u32 1536, %s2133_s21 }
  0x1a   : > { %v379_v4 = vsub.f32 %v375_v0, %v377_v1  ;;  %395 = vperm.xlu1 %2022, %v375_v0   ;;  %v380_v6 = vsub.f32 %v376_v2, %v378_v5  ;;  %v1837_v9 = vld [vmem:[%s3018_s2 + $0x10] sm:$0xff]  ;;  %v428_v11 = vsub.f32 %v1838_v7, %v1840_v8  ;;  %v1842_v13 = vld [vmem:[%s3018_s2 + $0x28] sm:$0xff]  ;;  %v1841_v15 = vld [vmem:[%s3018_s2 + $0x20] sm:$0xff]  ;;  %s311_s29 = scalar_select %p310_p11, %s2133_s21, 1 }
  0x1b   : > { %v1839_v10 = vld [vmem:[%s3019_s3 + $0x10] sm:$0xff]  ;;  %v1844_v14 = vld [vmem:[%s3019_s3 + $0x28] sm:$0xff]  ;;  %v1843_v16 = vld [vmem:[%s3019_s3 + $0x20] sm:$0xff]  ;;  %s2916_s15 = scalar_lea.hbm %s3021_s5, %s1956_s10  ;;  %s1638_s24 = scalar_lea.sflag [#allocation5], %s2563_s16 }
  0x1c   : > { %383 = vperm.xlu0 %2021, %v379_v4   ;;  %v427_v12 = vsub.f32 %v1837_v9, %v1839_v10  ;;  %v480_v17 = vsub.f32 %v1842_v13, %v1844_v14  ;;  %v479_v18 = vsub.f32 %v1841_v15, %v1843_v16  ;;  %v1846_v19 = vld [vmem:[%s3018_s2 + $0x38] sm:$0xff]  ;;  %v1845_v21 = vld [vmem:[%s3018_s2 + $0x30] sm:$0xff]  ;;  %v1850_v25 = vld [vmem:[%s3018_s2 + $0x48] sm:$0xff]  ;;  %s1953_s7 = sshll.u32 %s311_s29, 6  ;;  %s2144_s27 = smov [#allocation4]  }
  0x1d   : > { %v1848_v20 = vld [vmem:[%s3019_s3 + $0x38] sm:$0xff]  ;;  %v1847_v22 = vld [vmem:[%s3019_s3 + $0x30] sm:$0xff]  ;;  %v1852_v26 = vld [vmem:[%s3019_s3 + $0x48] sm:$0xff]  ;;  %s2422_s14 = scalar_lea.vmem %s3016_s0, %s1953_s7  ;;  %s2427_s17 = scalar_lea.vmem %s3017_s1, %s1953_s7 }
  0x1e   : > { %400 = vperm.xlu1 %2022, %v376_v2   ;;  %v532_v23 = vsub.f32 %v1846_v19, %v1848_v20  ;;  %v531_v24 = vsub.f32 %v1845_v21, %v1847_v22  ;;  %v1849_v27 = vld [vmem:[%s3018_s2 + $0x40] sm:$0xff]  ;;  %v589_v29 = vsub.f32 %v1850_v25, %v1852_v26  ;;  %v1854_v31 = vld [vmem:[%s3018_s2 + $0x58] sm:$0xff]  ;;  %v1853_v33 = vld [vmem:[%s3018_s2 + $0x50] sm:$0xff]  ;;  %s2035_s29 = sshll.u32 %s2144_s27, 4  ;;  %s2036_s29 = int_to_ptr.vmem [resolvable:$false] %s2035_s29 }
  0x1f   : > { %v1851_v28 = vld [vmem:[%s3019_s3 + $0x40] sm:$0xff]  ;;  %v1856_v32 = vld [vmem:[%s3019_s3 + $0x58] sm:$0xff]  ;;  %v1855_v34 = vld [vmem:[%s3019_s3 + $0x50] sm:$0xff]  ;;  %s2037_s8 = scalar_lea.vmem %s2036_s29, 3072 }
  0x20   : > { %388 = vperm.xlu0 %2021, %v380_v6   ;;  %v588_v30 = vsub.f32 %v1849_v27, %v1851_v28  ;;  %v637_v35 = vsub.f32 %v1854_v31, %v1856_v32  ;;  %v636_v36 = vsub.f32 %v1853_v33, %v1855_v34  ;;  %v1858_v37 = vld [vmem:[%s3018_s2 + $0x68] sm:$0xff]  ;;  %v1857_v39 = vld [vmem:[%s3018_s2 + $0x60] sm:$0xff]  ;;  %v1862_v43 = vld [vmem:[%s3018_s2 + $0x78] sm:$0xff] }
  0x21   : > { %v1860_v38 = vld [vmem:[%s3019_s3 + $0x68] sm:$0xff]  ;;  %v1859_v40 = vld [vmem:[%s3019_s3 + $0x60] sm:$0xff]  ;;  %v1864_v44 = vld [vmem:[%s3019_s3 + $0x78] sm:$0xff] }
  0x22   : > { %412 = vperm.xlu1 %2022, %v378_v5   ;;  %v689_v41 = vsub.f32 %v1858_v37, %v1860_v38  ;;  %v688_v42 = vsub.f32 %v1857_v39, %v1859_v40  ;;  %v1861_v45 = vld [vmem:[%s3018_s2 + $0x70] sm:$0xff]  ;;  %v741_v47 = vsub.f32 %v1862_v43, %v1864_v44  ;;  %v1870_v49 = vld [vmem:[%s3018_s2 + $0x88] sm:$0xff]  ;;  %v1869_v51 = vld [vmem:[%s3018_s2 + $0x80] sm:$0xff] }
  0x23   : > { %v1863_v46 = vld [vmem:[%s3019_s3 + $0x70] sm:$0xff]  ;;  %v1872_v50 = vld [vmem:[%s3019_s3 + $0x88] sm:$0xff]  ;;  %v1871_v52 = vld [vmem:[%s3019_s3 + $0x80] sm:$0xff] }
  0x24   : > { %407 = vperm.xlu0 %2021, %v377_v1   ;;  %v740_v48 = vsub.f32 %v1861_v45, %v1863_v46  ;;  %v799_v53 = vsub.f32 %v1870_v49, %v1872_v50  ;;  %v798_v54 = vsub.f32 %v1869_v51, %v1871_v52  ;;  %v1874_v55 = vld [vmem:[%s3018_s2 + $0x98] sm:$0xff]  ;;  %v1873_v57 = vld [vmem:[%s3018_s2 + $0x90] sm:$0xff]  ;;  %v1878_v61 = vld [vmem:[%s3018_s2 + $0xa8] sm:$0xff] }
  0x25   : > { %v1876_v56 = vld [vmem:[%s3019_s3 + $0x98] sm:$0xff]  ;;  %v1875_v58 = vld [vmem:[%s3019_s3 + $0x90] sm:$0xff]  ;;  %v1880_v62 = vld [vmem:[%s3019_s3 + $0xa8] sm:$0xff] }
  0x26   : > { %436 = vperm.xlu1 %2022, %v428_v11   ;;  %v847_v59 = vsub.f32 %v1874_v55, %v1876_v56  ;;  %v846_v60 = vsub.f32 %v1873_v57, %v1875_v58  ;;  %v1877_v63 = vld [vmem:[%s3018_s2 + $0xa0] sm:$0xff]  ;;  %v899_v1 = vsub.f32 %v1878_v61, %v1880_v62  ;;  %v1882_v3 = vld [vmem:[%s3018_s2 + $0xb8] sm:$0xff]  ;;  %v1881_v5 = vld [vmem:[%s3018_s2 + $0xb0] sm:$0xff] }
  0x27   : > { %v1879_v0 = vld [vmem:[%s3019_s3 + $0xa0] sm:$0xff]  ;;  %v1884_v4 = vld [vmem:[%s3019_s3 + $0xb8] sm:$0xff]  ;;  %v1883_v6 = vld [vmem:[%s3019_s3 + $0xb0] sm:$0xff] }
  0x28   : > { %431 = vperm.xlu0 %2021, %v427_v12   ;;  %v898_v2 = vsub.f32 %v1877_v63, %v1879_v0 }
  0x2a   : > { %448 = vperm.xlu1 %2022, %v1838_v7  }
  0x2c   : > { %443 = vperm.xlu0 %2021, %v1837_v9   ;;  %v951_v9 = vsub.f32 %v1882_v3, %v1884_v4 }
  0x2e   : > { %460 = vperm.xlu1 %2022, %v1840_v8  }
  0x30   : > { %455 = vperm.xlu0 %2021, %v1839_v10   ;;  %v950_v10 = vsub.f32 %v1881_v5, %v1883_v6 }
  0x32   : > { %488 = vperm.xlu1 %2022, %v480_v17   ;;  %v1889_v17 = vld [vmem:[%s3018_s2 + $0xc0] sm:$0xff] }
  0x34   : > { %483 = vperm.xlu0 %2021, %v479_v18   ;;  %v1891_v18 = vld [vmem:[%s3019_s3 + $0xc0] sm:$0xff] }
  0x36   : > { %500 = vperm.xlu1 %2022, %v1842_v13  }
  0x38   : > { %495 = vperm.xlu0 %2021, %v1841_v15   ;;  %v1890_v15 = vld [vmem:[%s3018_s2 + $0xc8] sm:$0xff] }
  0x3a   : > { %512 = vperm.xlu1 %2022, %v1844_v14  }
  0x3c   : > { %507 = vperm.xlu0 %2021, %v1843_v16   ;;  %v1892_v16 = vld [vmem:[%s3019_s3 + $0xc8] sm:$0xff] }
  0x3e   : > { %540 = vperm.xlu1 %2022, %v532_v23  }
  0x40   : > { %535 = vperm.xlu0 %2021, %v531_v24  }
  0x42   : > { %552 = vperm.xlu1 %2022, %v1846_v19  }
  0x44   : > { %547 = vperm.xlu0 %2021, %v1845_v21   ;;  %v1009_v21 = vsub.f32 %v1890_v15, %v1892_v16 }
  0x46   : > { %564 = vperm.xlu1 %2022, %v1848_v20  }
  0x48   : > { %559 = vperm.xlu0 %2021, %v1847_v22   ;;  %v1008_v22 = vsub.f32 %v1889_v17, %v1891_v18 }
  0x4a   : > { %597 = vperm.xlu1 %2022, %v589_v29   ;;  %v1893_v29 = vld [vmem:[%s3018_s2 + $0xd0] sm:$0xff] }
  0x4c   : > { %592 = vperm.xlu0 %2021, %v588_v30   ;;  %v2435_v30 = vld [vmem:[%s3019_s3 + $0xd0] sm:$0xff] }
  0x4e   : > { %609 = vperm.xlu1 %2022, %v1850_v25  }
  0x50   : > { %604 = vperm.xlu0 %2021, %v1849_v27   ;;  %v1894_v27 = vld [vmem:[%s3018_s2 + $0xd8] sm:$0xff] }
  0x52   : > { %621 = vperm.xlu1 %2022, %v1852_v26  }
  0x54   : > { %616 = vperm.xlu0 %2021, %v1851_v28   ;;  %v2417_v28 = vld [vmem:[%s3019_s3 + $0xd8] sm:$0xff] }
  0x56   : > { %645 = vperm.xlu1 %2022, %v637_v35   ;;  %v339_v35 = vld [vmem:[%s2427_s17] sm:$0xff] }
  0x58   : > { %640 = vperm.xlu0 %2021, %v636_v36   ;;  %v1828_v36 = vld [vmem:[%s2427_s17 + $0x18] sm:$0xff] }
  0x5a   : > { %657 = vperm.xlu1 %2022, %v1854_v31  }
  0x5c   : > { %652 = vperm.xlu0 %2021, %v1853_v33   ;;  %v1057_v33 = vsub.f32 %v1894_v27, %v2417_v28 }
  0x5e   : > { %669 = vperm.xlu1 %2022, %v1856_v32  }
  0x60   : > { %664 = vperm.xlu0 %2021, %v1855_v34   ;;  %v2443_v34 = vld [vmem:[%s2422_s14] sm:$0xff] }
  0x62   : > { %697 = vperm.xlu1 %2022, %v689_v41   ;;  %v2454_v41 = vld [vmem:[%s2422_s14 + $0x18] sm:$0xff] }
  0x64   : > { %692 = vperm.xlu0 %2021, %v688_v42   ;;  %v2457_v42 = vld [vmem:[%s2422_s14 + $0x10] sm:$0xff] }
  0x66   : > { %709 = vperm.xlu1 %2022, %v1858_v37   ;;  %v1056_v37 = vsub.f32 %v1893_v29, %v2435_v30 }
  0x68   : > { %704 = vperm.xlu0 %2021, %v1857_v39   ;;  %v340_v39 = vld [vmem:[%s2427_s17 + $0x8] sm:$0xff] }
  0x6a   : > { %721 = vperm.xlu1 %2022, %v1860_v38   ;;  %v2449_v38 = vld [vmem:[%s2422_s14 + $0x8] sm:$0xff] }
  0x6c   : > { %716 = vperm.xlu0 %2021, %v1859_v40   ;;  %v1827_v40 = vld [vmem:[%s2427_s17 + $0x10] sm:$0xff] }
  0x6e   : > { %749 = vperm.xlu1 %2022, %v741_v47   ;;  %v2467_v47 = vld [vmem:[%s2422_s14 + $0x20] sm:$0xff] }
  0x70   : > { %744 = vperm.xlu0 %2021, %v740_v48  }
  0x72   : > { %761 = vperm.xlu1 %2022, %v1862_v43  }
  0x74   : > { %756 = vperm.xlu0 %2021, %v1861_v45   ;;  %v2461_v45 = vsub.f32 %v1828_v36, %v2454_v41 }
  0x76   : > { %773 = vperm.xlu1 %2022, %v1864_v44   ;;  %v1832_v44 = vld [vmem:[%s2427_s17 + $0x28] sm:$0xff] }
  0x78   : > { %768 = vperm.xlu0 %2021, %v1863_v46   ;;  %v2464_v46 = vld [vmem:[%s2422_s14 + $0x28] sm:$0xff] }
  0x7a   : > { %807 = vperm.xlu1 %2022, %v799_v53   ;;  %v2482_v53 = vld [vmem:[%s3019_s3 + $0xe8] sm:$0xff] }
  0x7c   : > { %802 = vperm.xlu0 %2021, %v798_v54   ;;  %v2485_v54 = vsub.f32 %v339_v35, %v2443_v34 }
  0x7e   : > { %819 = vperm.xlu1 %2022, %v1870_v49   ;;  %v1831_v49 = vld [vmem:[%s2427_s17 + $0x20] sm:$0xff] }
  0x80   : > { %814 = vperm.xlu0 %2021, %v1869_v51   ;;  %v1836_v51 = vld [vmem:[%s2427_s17 + $0x38] sm:$0xff] }
  0x82   : > { %831 = vperm.xlu1 %2022, %v1872_v50   ;;  %v2471_v50 = vsub.f32 %v1827_v40, %v2457_v42 }
  0x84   : > { %826 = vperm.xlu0 %2021, %v1871_v52   ;;  %v2477_v52 = vld [vmem:[%s3018_s2 + $0xe8] sm:$0xff] }
  0x86   : > { %855 = vperm.xlu1 %2022, %v847_v59   ;;  %v2500_v59 = vld [vmem:[%s3018_s2 + $0xe0] sm:$0xff] }
  0x88   : > { %850 = vperm.xlu0 %2021, %v846_v60   ;;  %v2505_v60 = vld [vmem:[%s3019_s3 + $0xe0] sm:$0xff] }
  0x8a   : > { %867 = vperm.xlu1 %2022, %v1874_v55   ;;  %v2488_v55 = vsub.f32 %v340_v39, %v2449_v38 }
  0x8c   : > { %862 = vperm.xlu0 %2021, %v1873_v57   ;;  %v2494_v57 = vsub.f32 %v1832_v44, %v2464_v46 }
  0x8e   : > { %879 = vperm.xlu1 %2022, %v1876_v56   ;;  %v2491_v56 = vadd.f32 %v340_v39, %v2449_v38 }
  0x90   : > { %874 = vperm.xlu0 %2021, %v1875_v58   ;;  %v1835_v58 = vld [vmem:[%s2427_s17 + $0x30] sm:$0xff]  ;;  %s1955_s17 = smul.u32 96, %s2563_s16 }
  0x92   : > { %907 = vperm.xlu1 %2022, %v899_v1   ;;  %s2599_s7 = scalar_lea.vmem [#allocation4], %s1955_s17  ;;  %s2619_s12 = scalar_lea.vmem [#allocation2], %s1955_s17 }
  0x93   : > { %s1673_s11 = sshll.u32 %s2599_s7, 4  ;;  %s1654_s17 = sshll.u32 %s2619_s12, 4  ;;  %s2918_s11 = int_to_ptr.vmem [resolvable:$true] %s1673_s11  ;;  %s2961_s17 = int_to_ptr.vmem [resolvable:$true] %s1654_s17 }
  0x94   : > { %902 = vperm.xlu0 %2021, %v898_v2   ;;  %v2520_v2 = vld [vmem:[%s2422_s14 + $0x38] sm:$0xff]  ;;  %s2031_s25 = scalar_lea.vmem %s2918_s11, 1536  ;;  %p2038_p1 = scmp.lt.s32.totalorder %s2918_s11, %s2036_s29 }
  0x95   : > { %p2032_p12 = scmp.ne.s32.totalorder %s2918_s11, %s2031_s25  ;;  %p2039_p2 = scmp.lt.s32.totalorder %s2037_s8, %s2031_s25 }
  0x96   : > { %919 = vperm.xlu1 %2022, %v1878_v61   ;;  %v2508_v61 = vadd.f32 %v339_v35, %v2443_v34 }
  0x97   : > { %p2033_p13 = pnand %p2032_p12, %p2218_p4  ;;  %p2040_p3 = por %p2039_p2, %p2038_p1 }
  0x98   : > { %914 = vperm.xlu0 %2021, %v1877_v63   ;;  %v2514_v63 = vadd.f32 %v1827_v40, %v2457_v42 }
  0x99   : > { %v2377_v7 = vpop.permute.xlu1 %395  ;;  %p2034_p0 = pneg %p2033_p13 }
  0x9a   : > { %931 = vperm.xlu1 %2022, %v1880_v62   ;;  %v2511_v62 = vadd.f32 %v1828_v36, %v2454_v41 }
  0x9b   : > { %v2379_v8 = vpop.permute.xlu0 %383  ;;  %p2041_p5 = pnand %p2040_p3, %p2034_p0 }
  0x9c   : > { %926 = vperm.xlu0 %2021, %v1879_v0   ;;  %v2517_v0 = vsub.f32 %v1831_v49, %v2467_v47 }
  0x9d   : > { %v2381_v11 = vpop.permute.xlu1 %400 }
  0x9e   : > { %959 = vperm.xlu1 %2022, %v951_v9   ;;  %v2530_v9 = vld [vmem:[%s2422_s14 + $0x30] sm:$0xff] }
  0x9f   : > { %v2383_v12 = vpop.permute.xlu0 %388 }
  0xa0   : > { %954 = vperm.xlu0 %2021, %v950_v10   ;;  %v2533_v10 = vsub.f32 %v1836_v51, %v2520_v2 }
  0xa1   : > { %v2385_v13 = vpop.permute.xlu1 %412 }
  0xa2   : > { %971 = vperm.xlu1 %2022, %v1882_v3  }
  0xa3   : > { %v2387_v14 = vpop.permute.xlu0 %407 }
  0xa4   : > { %966 = vperm.xlu0 %2021, %v1881_v5  }
  0xa5   : > { %v2402_v19 = vpop.permute.xlu1 %436 }
  0xa6   : > { %983 = vperm.xlu1 %2022, %v1884_v4   ;;  %v2524_v4 = vadd.f32 %v1832_v44, %v2464_v46 }
  0xa7   : > { %v2404_v20 = vpop.permute.xlu0 %431 }
  0xa8   : > { %978 = vperm.xlu0 %2021, %v1883_v6   ;;  %v2527_v6 = vadd.f32 %v1831_v49, %v2467_v47 }
  0xa9   : > { %v449_v23 = vpop.permute.xlu1 %448 }
  0xaa   : > { %1017 = vperm.xlu1 %2022, %v1009_v21   ;;  %v452_v3 = vmul.f32 %v449_v23, %v2461_v45  ;;  %3026 = vst [vmem:[#allocation8_spill] sm:$0xff] %v2527_v6  ;;  %v404_v21 = vmul.f32 %v2381_v11, %v2488_v55  ;;  %v440_v23 = vmul.f32 %v2454_v41, %v2402_v19 }
  0xab   : > { %v444_v24 = vpop.permute.xlu0 %443 }
  0xac   : > { %1012 = vperm.xlu0 %2021, %v1008_v22   ;;  %v392_v22 = vmul.f32 %v2383_v12, %v2449_v38  ;;  %v470_v36 = vadd.f32 %v452_v3, %v440_v23 }
  0xad   : > { %v2407_v25 = vpop.permute.xlu1 %460 }
  0xae   : > { %1029 = vperm.xlu1 %2022, %v1890_v15   ;;  %v451_v15 = vmul.f32 %v444_v24, %v2471_v50  ;;  %v464_v12 = vmul.f32 %v2407_v25, %v2511_v62  ;;  %v2574_v25 = vadd.f32 %v1835_v58, %v2530_v9 }
  0xaf   : > { %v2409_v26 = vpop.permute.xlu0 %455 }
  0xb0   : > { %1024 = vperm.xlu0 %2021, %v1889_v17   ;;  %v2539_v17 = vsub.f32 %v1835_v58, %v2530_v9 }
  0xb1   : > { %v2437_v31 = vpop.permute.xlu1 %488 }
  0xb2   : > { %1041 = vperm.xlu1 %2022, %v1892_v16   ;;  %v1109_v16 = vsub.f32 %v2477_v52, %v2482_v53  ;;  %v492_v19 = vmul.f32 %v2464_v46, %v2437_v31  ;;  %v416_v31 = vmul.f32 %v2385_v13, %v2491_v56 }
  0xb3   : > { %v2439_v32 = vpop.permute.xlu0 %483 }
  0xb4   : > { %1036 = vperm.xlu0 %2021, %v1891_v18   ;;  %v1108_v18 = vsub.f32 %v2500_v59, %v2505_v60  ;;  %v491_v39 = vmul.f32 %v2467_v47, %v2439_v32 }
  0xb5   : > { %v501_v43 = vpop.permute.xlu1 %500 }
  0xb6   : > { %1065 = vperm.xlu1 %2022, %v1057_v33   ;;  %v504_v24 = vmul.f32 %v501_v43, %v2494_v57  ;;  %v439_v33 = vmul.f32 %v2457_v42, %v2404_v20 }
  0xb7   : > { %v496_v48 = vpop.permute.xlu0 %495 }
  0xb8   : > { %1060 = vperm.xlu0 %2021, %v1056_v37   ;;  %v503_v35 = vmul.f32 %v496_v48, %v2517_v0  ;;  %v469_v20 = vadd.f32 %v451_v15, %v439_v33  ;;  %v463_v37 = vmul.f32 %v2409_v26, %v2514_v63  ;;  %v522_v40 = vadd.f32 %v504_v24, %v492_v19 }
  0xb9   : > { %v513_v1 = vpop.permute.xlu1 %512  ;;  %v415_v48 = vmul.f32 %v2387_v14, %v2508_v61  ;;  %v418_v14 = vadd.f32 %v416_v31, %v392_v22 }
  0xba   : > { %1077 = vperm.xlu1 %2022, %v1894_v27   ;;  %v403_v27 = vmul.f32 %v2377_v7, %v2485_v54  ;;  %v516_v43 = vmul.f32 %v513_v1, %v2524_v4  ;;  %v521_v26 = vadd.f32 %v503_v35, %v491_v39 }
  0xbb   : > { %v508_v5 = vpop.permute.xlu0 %507 }
  0xbc   : > { %1072 = vperm.xlu0 %2021, %v1893_v29   ;;  %v391_v29 = vmul.f32 %v2379_v8, %v2443_v34  ;;  %v2566_v8 = vadd.f32 %v1836_v51, %v2520_v2  ;;  %v515_v49 = vmul.f32 %v508_v5, %v2527_v6  ;;  %v466_v51 = vadd.f32 %v464_v12, %v440_v23 }
  0xbd   : > { %v541_v11 = vpop.permute.xlu1 %540  ;;  %v518_v5 = vadd.f32 %v516_v43, %v492_v19 }
  0xbe   : > { %1089 = vperm.xlu1 %2022, %v2417_v28   ;;  %v420_v28 = vadd.f32 %v404_v21, %v392_v22  ;;  %v419_v44 = vadd.f32 %v403_v27, %v391_v29  ;;  %v544_v58 = vmul.f32 %v2520_v2, %v541_v11  ;;  %v465_v21 = vadd.f32 %v463_v37, %v439_v33  ;;  %v1902_v22 = vld [vmem:[%s3018_s2 + $0xf8] sm:$0xff] }
  0xbf   : > { %v536_v7 = vpop.permute.xlu0 %535  ;;  %v417_v6 = vadd.f32 %v415_v48, %v391_v29  ;;  %v517_v23 = vadd.f32 %v515_v49, %v491_v39  ;;  %v1904_v29 = vld [vmem:[%s3019_s3 + $0xf8] sm:$0xff] }
  0xc0   : > { %1084 = vperm.xlu0 %2021, %v2435_v30   ;;  %v472_v30 = vadd.f32 %v470_v36, %v420_v28  ;;  %v471_v15 = vadd.f32 %v469_v20, %v419_v44  ;;  %v543_v1 = vmul.f32 %v2530_v9, %v536_v7  ;;  %v468_v28 = vadd.f32 %v466_v51, %v418_v14 }
  0xc1   : > { %v553_v32 = vpop.permute.xlu1 %552  ;;  %v467_v7 = vadd.f32 %v465_v21, %v417_v6  ;;  %v1903_v6 = vld [vmem:[%s3019_s3 + $0xf0] sm:$0xff]  ;;  %v1161_v48 = vsub.f32 %v1902_v22, %v1904_v29 }
  0xc2   : > { %v556_v3 = vmul.f32 %v553_v32, %v2533_v10  ;;  %1117 = vperm.xlu1 %2022, %v1109_v16   ;;  %v524_v27 = vadd.f32 %v522_v40, %v472_v30  ;;  %v523_v36 = vadd.f32 %v521_v26, %v471_v15  ;;  %v520_v19 = vadd.f32 %v518_v5, %v468_v28 }
  0xc3   : > { %v548_v13 = vpop.permute.xlu0 %547  ;;  %v519_v39 = vadd.f32 %v517_v23, %v467_v7  ;;  %v1916_v23 = vld [vmem:[%s3019_s3 + $0x118] sm:$0xff] }
  0xc4   : > { %v555_v24 = vmul.f32 %v548_v13, %v2539_v17  ;;  %1112 = vperm.xlu0 %2021, %v1108_v18   ;;  %v574_v35 = vadd.f32 %v556_v3, %v544_v58  ;;  %v1909_v3 = vld [vmem:[%s3018_s2 + $0x100] sm:$0xff] }
  0xc5   : > { %v565_v12 = vpop.permute.xlu1 %564  ;;  %v1911_v13 = vld [vmem:[%s3019_s3 + $0x100] sm:$0xff] }
  0xc6   : > { %v573_v11 = vadd.f32 %v555_v24, %v543_v1  ;;  %v576_v16 = vadd.f32 %v574_v35, %v524_v27  ;;  %v568_v20 = vmul.f32 %v565_v12, %v2566_v8  ;;  %1129 = vperm.xlu1 %2022, %v2477_v52   ;;  %v1218_v24 = vsub.f32 %v1909_v3, %v1911_v13  ;;  %v1915_v12 = vld [vmem:[%s3019_s3 + $0x110] sm:$0xff] }
  0xc7   : > { %v560_v33 = vpop.permute.xlu0 %559 }
  0xc8   : > { %v575_v37 = vadd.f32 %v573_v11, %v523_v36  ;;  %v567_v18 = vmul.f32 %v560_v33, %v2574_v25  ;;  %1124 = vperm.xlu0 %2021, %v2500_v59   ;;  %581 = vst.msk [vmem:[%s2599_s7 + $0x8] sm:$0xff] %vm577_vm0, %v576_v16  ;;  %v570_v52 = vadd.f32 %v568_v20, %v544_v58  ;;  %v1901_v59 = vld [vmem:[%s3018_s2 + $0xf0] sm:$0xff]  ;;  %v1912_v58 = vld [vmem:[%s3019_s3 + $0x108] sm:$0xff]  ;;  %v1914_v36 = vld [vmem:[%s3018_s2 + $0x118] sm:$0xff] }
  0xc9   : > { %v2611_v40 = vpop.permute.xlu1 %597  ;;  %v1160_v49 = vsub.f32 %v1901_v59, %v1903_v6  ;;  %v1913_v11 = vld [vmem:[%s3018_s2 + $0x110] sm:$0xff]  ;;  %v1267_v20 = vsub.f32 %v1914_v36, %v1916_v23 }
  0xca   : > { %580 = vst.msk [vmem:[%s2599_s7] sm:$0xff] %vm577_vm0, %v575_v37  ;;  %v569_v31 = vadd.f32 %v567_v18, %v543_v1  ;;  %v572_v43 = vadd.f32 %v570_v52, %v520_v19  ;;  %1141 = vperm.xlu1 %2022, %v2482_v53   ;;  %v1266_v33 = vsub.f32 %v1913_v11, %v1915_v12 }
  0xcb   : > { %v2614_v44 = vpop.permute.xlu0 %592 }
  0xcc   : > { %v571_v26 = vadd.f32 %v569_v31, %v519_v39  ;;  %1136 = vperm.xlu0 %2021, %v2505_v60   ;;  %579 = vst.msk [vmem:[%s2619_s12 + $0x8] sm:$0xff] %vm577_vm0, %v572_v43  ;;  %v1910_v60 = vld [vmem:[%s3018_s2 + $0x108] sm:$0xff] }
  0xcd   : > { %v610_v32 = vpop.permute.xlu1 %609  ;;  %v1219_v1 = vsub.f32 %v1910_v60, %v1912_v58 }
  0xce   : > { %578 = vst.msk [vmem:[%s2619_s12] sm:$0xff] %vm577_vm0, %v571_v26  ;;  %1169 = vperm.xlu1 %2022, %v1161_v48   ;;  %v613_v31 = vmul.f32 %v610_v32, %v2488_v55 }
  0xcf   : > { %v605_v30 = vpop.permute.xlu0 %604 }
  0xd0   : > { %1164 = vperm.xlu0 %2021, %v1160_v49   ;;  %v612_v49 = vmul.f32 %v605_v30, %v2485_v54  ;;  %v600_v30 = vmul.f32 %v2614_v44, %v2443_v34 }
  0xd1   : > { %v2625_v53 = vpop.permute.xlu1 %621 }
  0xd2   : > { %1181 = vperm.xlu1 %2022, %v1902_v22   ;;  %v1918_v22 = vld [vmem:[%s3018_s2 + $0x128] sm:$0xff] }
  0xd3   : > { %v2627_v51 = vpop.permute.xlu0 %616 }
  0xd4   : > { %1176 = vperm.xlu0 %2021, %v1901_v59   ;;  %v1917_v59 = vld [vmem:[%s3018_s2 + $0x120] sm:$0xff] }
  0xd5   : > { %v646_v15 = vpop.permute.xlu1 %645 }
  0xd6   : > { %1193 = vperm.xlu1 %2022, %v1904_v29   ;;  %v2659_v29 = vld [vmem:[%s3019_s3 + $0x128] sm:$0xff]  ;;  %v649_v43 = vmul.f32 %v2454_v41, %v646_v15 }
  0xd7   : > { %v641_v21 = vpop.permute.xlu0 %640  ;;  %v1319_v26 = vsub.f32 %v1918_v22, %v2659_v29 }
  0xd8   : > { %1188 = vperm.xlu0 %2021, %v1903_v6   ;;  %v2668_v6 = vld [vmem:[%s3019_s3 + $0x120] sm:$0xff] }
  0xd9   : > { %v658_v14 = vpop.permute.xlu1 %657 }
  0xda   : > { %1227 = vperm.xlu1 %2022, %v1219_v1   ;;  %v661_v19 = vmul.f32 %v658_v14, %v2461_v45  ;;  %v601_v1 = vmul.f32 %v2611_v40, %v2449_v38  ;;  %v625_v40 = vmul.f32 %v2625_v53, %v2491_v56 }
  0xdb   : > { %v653_v27 = vpop.permute.xlu0 %652 }
  0xdc   : > { %1222 = vperm.xlu0 %2021, %v1218_v24   ;;  %v660_v39 = vmul.f32 %v653_v27, %v2471_v50  ;;  %v679_v24 = vadd.f32 %v661_v19, %v649_v43 }
  0xdd   : > { %v670_v5 = vpop.permute.xlu1 %669 }
  0xde   : > { %1239 = vperm.xlu1 %2022, %v1910_v60   ;;  %v648_v60 = vmul.f32 %v2457_v42, %v641_v21  ;;  %v673_v32 = vmul.f32 %v670_v5, %v2511_v62 }
  0xdf   : > { %v665_v35 = vpop.permute.xlu0 %664 }
  0xe0   : > { %1234 = vperm.xlu0 %2021, %v1909_v3   ;;  %v678_v27 = vadd.f32 %v660_v39, %v648_v60  ;;  %v672_v21 = vmul.f32 %v665_v35, %v2514_v63  ;;  %v675_v35 = vadd.f32 %v673_v32, %v649_v43 }
  0xe1   : > { %v698_v28 = vpop.permute.xlu1 %697 }
  0xe2   : > { %1251 = vperm.xlu1 %2022, %v1912_v58   ;;  %v701_v15 = vmul.f32 %v2464_v46, %v698_v28 }
  0xe3   : > { %v693_v16 = vpop.permute.xlu0 %692 }
  0xe4   : > { %1246 = vperm.xlu0 %2021, %v1911_v13   ;;  %v1318_v13 = vsub.f32 %v1917_v59, %v2668_v6 }
  0xe5   : > { %v710_v7 = vpop.permute.xlu1 %709 }
  0xe6   : > { %1275 = vperm.xlu1 %2022, %v1267_v20   ;;  %v713_v48 = vmul.f32 %v710_v7, %v2494_v57  ;;  %v3027_v7 = vld [vmem:[#allocation8_spill] sm:$0xff] }
  0xe7   : > { %v705_v37 = vpop.permute.xlu0 %704 }
  0xe8   : > { %1270 = vperm.xlu0 %2021, %v1266_v33   ;;  %v712_v58 = vmul.f32 %v705_v37, %v2517_v0  ;;  %v731_v20 = vadd.f32 %v713_v48, %v701_v15  ;;  %v628_v33 = vadd.f32 %v612_v49, %v600_v30 }
  0xe9   : > { %v722_v18 = vpop.permute.xlu1 %721 }
  0xea   : > { %1287 = vperm.xlu1 %2022, %v1914_v36   ;;  %v700_v36 = vmul.f32 %v2467_v47, %v693_v16  ;;  %v725_v5 = vmul.f32 %v722_v18, %v2524_v4  ;;  %v680_v53 = vadd.f32 %v678_v27, %v628_v33 }
  0xeb   : > { %v717_v52 = vpop.permute.xlu0 %716 }
  0xec   : > { %1282 = vperm.xlu0 %2021, %v1913_v11   ;;  %v629_v11 = vadd.f32 %v613_v31, %v601_v1  ;;  %v730_v28 = vadd.f32 %v712_v58, %v700_v36  ;;  %v724_v44 = vmul.f32 %v717_v52, %v3027_v7  ;;  %v674_v31 = vadd.f32 %v672_v21, %v648_v60 }
  0xed   : > { %v750_v3 = vpop.permute.xlu1 %749  ;;  %v727_v58 = vadd.f32 %v725_v5, %v701_v15  ;;  %v1924_v15 = vld [vmem:[%s3019_s3 + $0x138] sm:$0xff] }
  0xee   : > { %1299 = vperm.xlu1 %2022, %v1916_v23   ;;  %v624_v23 = vmul.f32 %v2627_v51, %v2508_v61  ;;  %v681_v19 = vadd.f32 %v679_v24, %v629_v11  ;;  %v753_v16 = vmul.f32 %v2520_v2, %v750_v3  ;;  %v627_v51 = vadd.f32 %v625_v40, %v601_v1  ;;  %v1922_v1 = vld [vmem:[%s3018_s2 + $0x138] sm:$0xff] }
  0xef   : > { %v745_v14 = vpop.permute.xlu0 %744  ;;  %v732_v24 = vadd.f32 %v730_v28, %v680_v53  ;;  %v726_v43 = vadd.f32 %v724_v44, %v700_v36  ;;  %v1921_v36 = vld [vmem:[%s3018_s2 + $0x130] sm:$0xff]  ;;  %v1371_v28 = vsub.f32 %v1922_v1, %v1924_v15 }
  0xf0   : > { %1294 = vperm.xlu0 %2021, %v1915_v12   ;;  %v752_v18 = vmul.f32 %v2530_v9, %v745_v14  ;;  %v733_v49 = vadd.f32 %v731_v20, %v681_v19  ;;  %v626_v7 = vadd.f32 %v624_v23, %v600_v30  ;;  %v677_v11 = vadd.f32 %v675_v35, %v627_v51 }
  0xf1   : > { %v762_v37 = vpop.permute.xlu1 %761 }
  0xf2   : > { %v765_v12 = vmul.f32 %v762_v37, %v2533_v10  ;;  %1327 = vperm.xlu1 %2022, %v1319_v26   ;;  %v676_v27 = vadd.f32 %v674_v31, %v626_v7  ;;  %v729_v30 = vadd.f32 %v727_v58, %v677_v11 }
  0xf3   : > { %v757_v39 = vpop.permute.xlu0 %756 }
  0xf4   : > { %v764_v48 = vmul.f32 %v757_v39, %v2539_v17  ;;  %1322 = vperm.xlu0 %2021, %v1318_v13   ;;  %v783_v52 = vadd.f32 %v765_v12, %v753_v16  ;;  %v728_v40 = vadd.f32 %v726_v43, %v676_v27  ;;  %v1929_v12 = vld [vmem:[%s3018_s2 + $0x140] sm:$0xff]  ;;  %v1936_v43 = vld [vmem:[%s3019_s3 + $0x158] sm:$0xff] }
  0xf5   : > { %v774_v32 = vpop.permute.xlu1 %773  ;;  %v1931_v39 = vld [vmem:[%s3019_s3 + $0x140] sm:$0xff] }
  0xf6   : > { %v782_v3 = vadd.f32 %v764_v48, %v752_v18  ;;  %v785_v26 = vadd.f32 %v783_v52, %v733_v49  ;;  %v777_v60 = vmul.f32 %v774_v32, %v2566_v8  ;;  %1339 = vperm.xlu1 %2022, %v1918_v22   ;;  %v1428_v48 = vsub.f32 %v1929_v12, %v1931_v39  ;;  %v1935_v32 = vld [vmem:[%s3019_s3 + $0x150] sm:$0xff] }
  0xf7   : > { %v769_v14 = vpop.permute.xlu0 %768 }
  0xf8   : > { %v784_v21 = vadd.f32 %v782_v3, %v732_v24  ;;  %v776_v13 = vmul.f32 %v769_v14, %v2574_v25  ;;  %1334 = vperm.xlu0 %2021, %v1917_v59   ;;  %1868 = vst.msk [vmem:[%s2599_s7 + $0x18] sm:$0xff] %vm577_vm0, %v785_v26  ;;  %v779_v22 = vadd.f32 %v777_v60, %v753_v16  ;;  %v1923_v59 = vld [vmem:[%s3019_s3 + $0x130] sm:$0xff]  ;;  %v1934_v24 = vld [vmem:[%s3018_s2 + $0x158] sm:$0xff] }
  0xf9   : > { %v2715_v5 = vpop.permute.xlu1 %807  ;;  %v1370_v44 = vsub.f32 %v1921_v36, %v1923_v59  ;;  %v1933_v3 = vld [vmem:[%s3018_s2 + $0x150] sm:$0xff]  ;;  %v1477_v60 = vsub.f32 %v1934_v24, %v1936_v43 }
  0xfa   : > { %1867 = vst.msk [vmem:[%s2599_s7 + $0x10] sm:$0xff] %vm577_vm0, %v784_v21  ;;  %v778_v20 = vadd.f32 %v776_v13, %v752_v18  ;;  %v781_v33 = vadd.f32 %v779_v22, %v729_v30  ;;  %1351 = vperm.xlu1 %2022, %v2659_v29   ;;  %v1930_v29 = vld [vmem:[%s3018_s2 + $0x148] sm:$0xff]  ;;  %v1476_v14 = vsub.f32 %v1933_v3, %v1935_v32 }
  0xfb   : > { %v2718_v23 = vpop.permute.xlu0 %802 }
  0xfc   : > { %v780_v7 = vadd.f32 %v778_v20, %v728_v40  ;;  %1346 = vperm.xlu0 %2021, %v2668_v6   ;;  %1866 = vst.msk [vmem:[%s2619_s12 + $0x18] sm:$0xff] %vm577_vm0, %v781_v33  ;;  %v1932_v6 = vld [vmem:[%s3019_s3 + $0x148] sm:$0xff] }
  0xfd   : > { %v820_v37 = vpop.permute.xlu1 %819  ;;  %v1429_v18 = vsub.f32 %v1930_v29, %v1932_v6 }
  0xfe   : > { %1865 = vst.msk [vmem:[%s2619_s12 + $0x10] sm:$0xff] %vm577_vm0, %v780_v7  ;;  %1379 = vperm.xlu1 %2022, %v1371_v28   ;;  %v823_v20 = vmul.f32 %v820_v37, %v2488_v55 }
  0xff   : > { %v815_v19 = vpop.permute.xlu0 %814 }
 0x100   : > { %1374 = vperm.xlu0 %2021, %v1370_v44   ;;  %v822_v44 = vmul.f32 %v815_v19, %v2485_v54  ;;  %v810_v19 = vmul.f32 %v2718_v23, %v2443_v34 }
 0x101   : > { %v2725_v35 = vpop.permute.xlu1 %831 }
 0x102   : > { %1391 = vperm.xlu1 %2022, %v1922_v1   ;;  %v1938_v1 = vld [vmem:[%s3018_s2 + $0x168] sm:$0xff] }
 0x103   : > { %v2727_v16 = vpop.permute.xlu0 %826 }
 0x104   : > { %1386 = vperm.xlu0 %2021, %v1921_v36   ;;  %v1937_v36 = vld [vmem:[%s3018_s2 + $0x160] sm:$0xff] }
 0x105   : > { %v856_v53 = vpop.permute.xlu1 %855 }
 0x106   : > { %1403 = vperm.xlu1 %2022, %v1924_v15   ;;  %v2759_v15 = vld [vmem:[%s3019_s3 + $0x168] sm:$0xff]  ;;  %v859_v33 = vmul.f32 %v2454_v41, %v856_v53 }
 0x107   : > { %v851_v31 = vpop.permute.xlu0 %850  ;;  %v1529_v7 = vsub.f32 %v1938_v1, %v2759_v15 }
 0x108   : > { %1398 = vperm.xlu0 %2021, %v1923_v59   ;;  %v2768_v59 = vld [vmem:[%s3019_s3 + $0x160] sm:$0xff] }
 0x109   : > { %v868_v51 = vpop.permute.xlu1 %867 }
 0x10a   : > { %1437 = vperm.xlu1 %2022, %v1429_v18   ;;  %v871_v30 = vmul.f32 %v868_v51, %v2461_v45  ;;  %v811_v18 = vmul.f32 %v2715_v5, %v2449_v38  ;;  %v835_v5 = vmul.f32 %v2725_v35, %v2491_v56 }
 0x10b   : > { %v863_v49 = vpop.permute.xlu0 %862 }
 0x10c   : > { %1432 = vperm.xlu0 %2021, %v1428_v48   ;;  %v870_v40 = vmul.f32 %v863_v49, %v2471_v50  ;;  %v889_v48 = vadd.f32 %v871_v30, %v859_v33 }
 0x10d   : > { %v880_v58 = vpop.permute.xlu1 %879 }
 0x10e   : > { %1449 = vperm.xlu1 %2022, %v1930_v29   ;;  %v858_v29 = vmul.f32 %v2457_v42, %v851_v31  ;;  %v883_v37 = vmul.f32 %v880_v58, %v2511_v62 }
 0x10f   : > { %v875_v52 = vpop.permute.xlu0 %874 }
 0x110   : > { %1444 = vperm.xlu0 %2021, %v1929_v12   ;;  %v888_v49 = vadd.f32 %v870_v40, %v858_v29  ;;  %v882_v31 = vmul.f32 %v875_v52, %v2514_v63  ;;  %v885_v52 = vadd.f32 %v883_v37, %v859_v33 }
 0x111   : > { %v908_v11 = vpop.permute.xlu1 %907 }
 0x112   : > { %1461 = vperm.xlu1 %2022, %v1932_v6   ;;  %v911_v53 = vmul.f32 %v2464_v46, %v908_v11 }
 0x113   : > { %v903_v26 = vpop.permute.xlu0 %902 }
 0x114   : > { %1456 = vperm.xlu0 %2021, %v1931_v39   ;;  %v1528_v39 = vsub.f32 %v1937_v36, %v2768_v59 }
 0x115   : > { %v920_v27 = vpop.permute.xlu1 %919 }
 0x116   : > { %1485 = vperm.xlu1 %2022, %v1477_v60   ;;  %v923_v28 = vmul.f32 %v920_v27, %v2494_v57  ;;  %v3028_v27 = vld [vmem:[#allocation8_spill] sm:$0xff] }
 0x117   : > { %v915_v21 = vpop.permute.xlu0 %914 }
 0x118   : > { %1480 = vperm.xlu0 %2021, %v1476_v14   ;;  %v922_v6 = vmul.f32 %v915_v21, %v2517_v0  ;;  %v941_v60 = vadd.f32 %v923_v28, %v911_v53  ;;  %v838_v14 = vadd.f32 %v822_v44, %v810_v19 }
 0x119   : > { %v932_v13 = vpop.permute.xlu1 %931 }
 0x11a   : > { %1497 = vperm.xlu1 %2022, %v1934_v24   ;;  %v910_v24 = vmul.f32 %v2467_v47, %v903_v26  ;;  %v935_v58 = vmul.f32 %v932_v13, %v2524_v4  ;;  %v890_v35 = vadd.f32 %v888_v49, %v838_v14 }
 0x11b   : > { %v927_v22 = vpop.permute.xlu0 %926 }
 0x11c   : > { %1492 = vperm.xlu0 %2021, %v1933_v3   ;;  %v839_v3 = vadd.f32 %v823_v20, %v811_v18  ;;  %v940_v11 = vadd.f32 %v922_v6, %v910_v24  ;;  %v934_v23 = vmul.f32 %v927_v22, %v3028_v27  ;;  %v884_v20 = vadd.f32 %v882_v31, %v858_v29 }
 0x11d   : > { %v960_v12 = vpop.permute.xlu1 %959  ;;  %v937_v6 = vadd.f32 %v935_v58, %v911_v53  ;;  %v1944_v53 = vld [vmem:[%s3019_s3 + $0x178] sm:$0xff] }
 0x11e   : > { %1509 = vperm.xlu1 %2022, %v1936_v43   ;;  %v834_v43 = vmul.f32 %v2727_v16, %v2508_v61  ;;  %v891_v30 = vadd.f32 %v889_v48, %v839_v3  ;;  %v963_v26 = vmul.f32 %v2520_v2, %v960_v12  ;;  %v837_v16 = vadd.f32 %v835_v5, %v811_v18  ;;  %v1942_v18 = vld [vmem:[%s3018_s2 + $0x178] sm:$0xff] }
 0x11f   : > { %v955_v51 = vpop.permute.xlu0 %954  ;;  %v942_v48 = vadd.f32 %v940_v11, %v890_v35  ;;  %v936_v33 = vadd.f32 %v934_v23, %v910_v24  ;;  %v1941_v24 = vld [vmem:[%s3018_s2 + $0x170] sm:$0xff]  ;;  %v1581_v11 = vsub.f32 %v1942_v18, %v1944_v53 }
 0x120   : > { %1504 = vperm.xlu0 %2021, %v1935_v32   ;;  %v962_v13 = vmul.f32 %v2530_v9, %v955_v51  ;;  %v943_v44 = vadd.f32 %v941_v60, %v891_v30  ;;  %v836_v27 = vadd.f32 %v834_v43, %v810_v19  ;;  %v887_v3 = vadd.f32 %v885_v52, %v837_v16 }
 0x121   : > { %v972_v21 = vpop.permute.xlu1 %971 }
 0x122   : > { %v975_v32 = vmul.f32 %v972_v21, %v2533_v10  ;;  %1537 = vperm.xlu1 %2022, %v1529_v7   ;;  %v886_v49 = vadd.f32 %v884_v20, %v836_v27  ;;  %v939_v19 = vadd.f32 %v937_v6, %v887_v3 }
 0x123   : > { %v967_v40 = vpop.permute.xlu0 %966 }
 0x124   : > { %v974_v28 = vmul.f32 %v967_v40, %v2539_v17  ;;  %1532 = vperm.xlu0 %2021, %v1528_v39   ;;  %v993_v22 = vadd.f32 %v975_v32, %v963_v26  ;;  %v938_v5 = vadd.f32 %v936_v33, %v886_v49 }
 0x125   : > { %v984_v37 = vpop.permute.xlu1 %983 }
 0x126   : > { %v992_v12 = vadd.f32 %v974_v28, %v962_v13  ;;  %v995_v7 = vadd.f32 %v993_v22, %v943_v44  ;;  %v987_v29 = vmul.f32 %v984_v37, %v2566_v8  ;;  %1549 = vperm.xlu1 %2022, %v1938_v1  }
 0x127   : > { %v979_v51 = vpop.permute.xlu0 %978 }
 0x128   : > { %v994_v31 = vadd.f32 %v992_v12, %v942_v48  ;;  %v986_v39 = vmul.f32 %v979_v51, %v2574_v25  ;;  %1544 = vperm.xlu0 %2021, %v1937_v36   ;;  %1888 = vst.msk [vmem:[%s2599_s7 + $0x28] sm:$0xff] %vm577_vm0, %v995_v7  ;;  %v989_v1 = vadd.f32 %v987_v29, %v963_v26  ;;  %v1943_v36 = vld [vmem:[%s3019_s3 + $0x170] sm:$0xff] }
 0x129   : > { %v1018_v58 = vpop.permute.xlu1 %1017  ;;  %v1580_v23 = vsub.f32 %v1941_v24, %v1943_v36 }
 0x12a   : > { %1887 = vst.msk [vmem:[%s2599_s7 + $0x20] sm:$0xff] %vm577_vm0, %v994_v31  ;;  %v988_v60 = vadd.f32 %v986_v39, %v962_v13  ;;  %v991_v14 = vadd.f32 %v989_v1, %v939_v19  ;;  %1561 = vperm.xlu1 %2022, %v2759_v15   ;;  %v1021_v31 = vmul.f32 %v1018_v58, %v2449_v38 }
 0x12b   : > { %v1013_v43 = vpop.permute.xlu0 %1012 }
 0x12c   : > { %v990_v27 = vadd.f32 %v988_v60, %v938_v5  ;;  %1556 = vperm.xlu0 %2021, %v2768_v59   ;;  %1886 = vst.msk [vmem:[%s2619_s12 + $0x28] sm:$0xff] %vm577_vm0, %v991_v14  ;;  %v1020_v1 = vmul.f32 %v1013_v43, %v2443_v34 }
 0x12d   : > { %v1030_v21 = vpop.permute.xlu1 %1029 }
 0x12e   : > { %1885 = vst.msk [vmem:[%s2619_s12 + $0x20] sm:$0xff] %vm577_vm0, %v990_v27  ;;  %1589 = vperm.xlu1 %2022, %v1581_v11   ;;  %v1033_v12 = vmul.f32 %v1030_v21, %v2488_v55 }
 0x12f   : > { %v1025_v30 = vpop.permute.xlu0 %1024 }
 0x130   : > { %1584 = vperm.xlu0 %2021, %v1580_v23   ;;  %v1032_v7 = vmul.f32 %v1025_v30, %v2485_v54  ;;  %v1049_v60 = vadd.f32 %v1033_v12, %v1021_v31  ;;  %v3029_v30 = vld [vmem:[#allocation8_spill] sm:$0xff] }
 0x131   : > { %v1042_v52 = vpop.permute.xlu1 %1041 }
 0x132   : > { %1601 = vperm.xlu1 %2022, %v1942_v18   ;;  %v1045_v14 = vmul.f32 %v1042_v52, %v2491_v56  ;;  %v1048_v58 = vadd.f32 %v1032_v7, %v1020_v1 }
 0x133   : > { %v1037_v26 = vpop.permute.xlu0 %1036 }
 0x134   : > { %1596 = vperm.xlu0 %2021, %v1941_v24   ;;  %v1044_v23 = vmul.f32 %v1037_v26, %v2508_v61 }
 0x135   : > { %v1066_v32 = vpop.permute.xlu1 %1065 }
 0x136   : > { %1613 = vperm.xlu1 %2022, %v1944_v53   ;;  %v1069_v37 = vmul.f32 %v2454_v41, %v1066_v32 }
 0x137   : > { %v1061_v15 = vpop.permute.xlu0 %1060 }
 0x138   : > { %1608 = vperm.xlu0 %2021, %v1943_v36   ;;  %v1068_v29 = vmul.f32 %v2457_v42, %v1061_v15 }
 0x139   : > { %v1078_v40 = vpop.permute.xlu1 %1077 }
 0x13a   : > { %v1081_v22 = vmul.f32 %v1078_v40, %v2461_v45 }
 0x13b   : > { %v1073_v35 = vpop.permute.xlu0 %1072 }
 0x13c   : > { %v1080_v33 = vmul.f32 %v1073_v35, %v2471_v50  ;;  %v1099_v39 = vadd.f32 %v1081_v22, %v1069_v37 }
 0x13d   : > { %v1090_v59 = vpop.permute.xlu1 %1089 }
 0x13e   : > { %v1093_v18 = vmul.f32 %v1090_v59, %v2511_v62  ;;  %v1098_v24 = vadd.f32 %v1080_v33, %v1068_v29  ;;  %v1101_v40 = vadd.f32 %v1099_v39, %v1049_v60 }
 0x13f   : > { %v1085_v20 = vpop.permute.xlu0 %1084 }
 0x140   : > { %v1092_v36 = vmul.f32 %v1085_v20, %v2514_v63  ;;  %v1095_v43 = vadd.f32 %v1093_v18, %v1069_v37 }
 0x141   : > { %v1118_v13 = vpop.permute.xlu1 %1117 }
 0x142   : > { %v1121_v53 = vmul.f32 %v2464_v46, %v1118_v13  ;;  %v1100_v13 = vadd.f32 %v1098_v24, %v1048_v58 }
 0x143   : > { %v1113_v28 = vpop.permute.xlu0 %1112 }
 0x144   : > { %v1120_v5 = vmul.f32 %v2467_v47, %v1113_v28  ;;  %v1094_v28 = vadd.f32 %v1092_v36, %v1068_v29 }
 0x145   : > { %v1130_v16 = vpop.permute.xlu1 %1129 }
 0x146   : > { %v1133_v3 = vmul.f32 %v1130_v16, %v2494_v57 }
 0x147   : > { %v1125_v44 = vpop.permute.xlu0 %1124 }
 0x148   : > { %v1132_v51 = vmul.f32 %v1125_v44, %v2517_v0  ;;  %v1151_v11 = vadd.f32 %v1133_v3, %v1121_v53  ;;  %v1047_v44 = vadd.f32 %v1045_v14, %v1021_v31 }
 0x149   : > { %v1142_v6 = vpop.permute.xlu1 %1141 }
 0x14a   : > { %v1145_v27 = vmul.f32 %v1142_v6, %v2524_v4  ;;  %v1150_v21 = vadd.f32 %v1132_v51, %v1120_v5  ;;  %v1153_v6 = vadd.f32 %v1151_v11, %v1101_v40  ;;  %v1097_v7 = vadd.f32 %v1095_v43, %v1047_v44 }
 0x14b   : > { %v1137_v48 = vpop.permute.xlu0 %1136 }
 0x14c   : > { %v1144_v32 = vmul.f32 %v1137_v48, %v3029_v30  ;;  %v1147_v26 = vadd.f32 %v1145_v27, %v1121_v53  ;;  %v1046_v48 = vadd.f32 %v1044_v23, %v1020_v1  ;;  %v1152_v33 = vadd.f32 %v1150_v21, %v1100_v13 }
 0x14d   : > { %v1170_v49 = vpop.permute.xlu1 %1169 }
 0x14e   : > { %v1173_v35 = vmul.f32 %v2520_v2, %v1170_v49  ;;  %v1146_v12 = vadd.f32 %v1144_v32, %v1120_v5  ;;  %v1096_v39 = vadd.f32 %v1094_v28, %v1046_v48 }
 0x14f   : > { %v1165_v19 = vpop.permute.xlu0 %1164 }
 0x150   : > { %v1172_v52 = vmul.f32 %v2530_v9, %v1165_v19  ;;  %v1149_v19 = vadd.f32 %v1147_v26, %v1097_v7  ;;  %v1148_v1 = vadd.f32 %v1146_v12, %v1096_v39 }
 0x151   : > { %v1182_v15 = vpop.permute.xlu1 %1181 }
 0x152   : > { %v1185_v59 = vmul.f32 %v1182_v15, %v2533_v10 }
 0x153   : > { %v1177_v20 = vpop.permute.xlu0 %1176 }
 0x154   : > { %v1184_v16 = vmul.f32 %v1177_v20, %v2539_v17  ;;  %v1203_v22 = vadd.f32 %v1185_v59, %v1173_v35 }
 0x155   : > { %v1194_v3 = vpop.permute.xlu1 %1193 }
 0x156   : > { %v1202_v37 = vadd.f32 %v1184_v16, %v1172_v52  ;;  %v1205_v51 = vadd.f32 %v1203_v22, %v1153_v6  ;;  %v1197_v29 = vmul.f32 %v1194_v3, %v2566_v8 }
 0x157   : > { %v1189_v49 = vpop.permute.xlu0 %1188 }
 0x158   : > { %v1204_v18 = vadd.f32 %v1202_v37, %v1152_v33  ;;  %v1196_v31 = vmul.f32 %v1189_v49, %v2574_v25  ;;  %1908 = vst.msk [vmem:[%s2599_s7 + $0x38] sm:$0xff] %vm577_vm0, %v1205_v51  ;;  %v1199_v53 = vadd.f32 %v1197_v29, %v1173_v35 }
 0x159   : > { %v1228_v36 = vpop.permute.xlu1 %1227 }
 0x15a   : > { %1907 = vst.msk [vmem:[%s2599_s7 + $0x30] sm:$0xff] %vm577_vm0, %v1204_v18  ;;  %v1198_v24 = vadd.f32 %v1196_v31, %v1172_v52  ;;  %v1201_v5 = vadd.f32 %v1199_v53, %v1149_v19  ;;  %v1231_v7 = vmul.f32 %v1228_v36, %v2449_v38 }
 0x15b   : > { %v1223_v60 = vpop.permute.xlu0 %1222 }
 0x15c   : > { %v1200_v14 = vadd.f32 %v1198_v24, %v1148_v1  ;;  %1906 = vst.msk [vmem:[%s2619_s12 + $0x38] sm:$0xff] %vm577_vm0, %v1201_v5  ;;  %v1230_v18 = vmul.f32 %v1223_v60, %v2443_v34 }
 0x15d   : > { %v1240_v11 = vpop.permute.xlu1 %1239 }
 0x15e   : > { %1905 = vst.msk [vmem:[%s2619_s12 + $0x30] sm:$0xff] %vm577_vm0, %v1200_v14  ;;  %v1243_v26 = vmul.f32 %v1240_v11, %v2488_v55 }
 0x15f   : > { %v1235_v27 = vpop.permute.xlu0 %1234 }
 0x160   : > { %v1242_v33 = vmul.f32 %v1235_v27, %v2485_v54  ;;  %v1259_v53 = vadd.f32 %v1243_v26, %v1231_v7 }
 0x161   : > { %v1252_v58 = vpop.permute.xlu1 %1251 }
 0x162   : > { %v1258_v38 = vadd.f32 %v1242_v33, %v1230_v18 }
 0x163   : > { %v1247_v23 = vpop.permute.xlu0 %1246 }
 0x164   : > { %v1254_v36 = vmul.f32 %v1247_v23, %v2508_v61 }
 0x165   : > { %v1276_v21 = vpop.permute.xlu1 %1275 }
 0x166   : > { %v1279_v22 = vmul.f32 %v2454_v41, %v1276_v21 }
 0x167   : > { %v1271_v32 = vpop.permute.xlu0 %1270 }
 0x168   : > { %v1278_v12 = vmul.f32 %v2457_v42, %v1271_v32  ;;  %v1255_v42 = vmul.f32 %v1252_v58, %v2491_v56 }
 0x169   : > { %v1288_v15 = vpop.permute.xlu1 %1287 }
 0x16a   : > { %v1291_v16 = vmul.f32 %v1288_v15, %v2461_v45 }
 0x16b   : > { %v1283_v40 = vpop.permute.xlu0 %1282 }
 0x16c   : > { %v1290_v6 = vmul.f32 %v1283_v40, %v2471_v50  ;;  %v1309_v51 = vadd.f32 %v1291_v16, %v1279_v22  ;;  %v1257_v40 = vadd.f32 %v1255_v42, %v1231_v7 }
 0x16d   : > { %v1300_v43 = vpop.permute.xlu1 %1299 }
 0x16e   : > { %v1303_v29 = vmul.f32 %v1300_v43, %v2511_v62  ;;  %v1308_v41 = vadd.f32 %v1290_v6, %v1278_v12  ;;  %v1311_v11 = vadd.f32 %v1309_v51, %v1259_v53 }
 0x16f   : > { %v1295_v35 = vpop.permute.xlu0 %1294 }
 0x170   : > { %v1302_v31 = vmul.f32 %v1295_v35, %v2514_v63  ;;  %v1305_v34 = vadd.f32 %v1303_v29, %v1279_v22  ;;  %v1310_v21 = vadd.f32 %v1308_v41, %v1258_v38 }
 0x171   : > { %v1328_v59 = vpop.permute.xlu1 %1327 }
 0x172   : > { %v1331_v49 = vmul.f32 %v2464_v46, %v1328_v59  ;;  %v1304_v32 = vadd.f32 %v1302_v31, %v1278_v12  ;;  %v1256_v59 = vadd.f32 %v1254_v36, %v1230_v18 }
 0x173   : > { %v1323_v20 = vpop.permute.xlu0 %1322 }
 0x174   : > { %v1330_v19 = vmul.f32 %v2467_v47, %v1323_v20  ;;  %v1306_v6 = vadd.f32 %v1304_v32, %v1256_v59 }
 0x175   : > { %v1340_v13 = vpop.permute.xlu1 %1339 }
 0x176   : > { %v1343_v48 = vmul.f32 %v1340_v13, %v2494_v57 }
 0x177   : > { %v1335_v28 = vpop.permute.xlu0 %1334 }
 0x178   : > { %v1342_v37 = vmul.f32 %v1335_v28, %v2517_v0  ;;  %v1361_v1 = vadd.f32 %v1343_v48, %v1331_v49 }
 0x179   : > { %v1352_v52 = vpop.permute.xlu1 %1351 }
 0x17a   : > { %v1355_v24 = vmul.f32 %v1352_v52, %v2524_v4  ;;  %v1360_v5 = vadd.f32 %v1342_v37, %v1330_v19  ;;  %v1363_v43 = vadd.f32 %v1361_v1, %v1311_v11  ;;  %v1307_v52 = vadd.f32 %v1305_v34, %v1257_v40 }
 0x17b   : > { %v1347_v44 = vpop.permute.xlu0 %1346 }
 0x17c   : > { %v1354_v46 = vmul.f32 %v1347_v44, %v3029_v30  ;;  %v1357_v23 = vadd.f32 %v1355_v24, %v1331_v49  ;;  %v1362_v20 = vadd.f32 %v1360_v5, %v1310_v21 }
 0x17d   : > { %v1380_v3 = vpop.permute.xlu1 %1379 }
 0x17e   : > { %v1383_v60 = vmul.f32 %v2520_v2, %v1380_v3  ;;  %v1356_v13 = vadd.f32 %v1354_v46, %v1330_v19  ;;  %v1359_v48 = vadd.f32 %v1357_v23, %v1307_v52  ;;  %v2028_v52 = vld [vmem:[%s2422_s14 + $0x20] sm:$0xff] }
 0x17f   : > { %v1375_v39 = vpop.permute.xlu0 %1374 }
 0x180   : > { %v1382_v58 = vmul.f32 %v2530_v9, %v1375_v39  ;;  %v1358_v12 = vadd.f32 %v1356_v13, %v1306_v6 }
 0x181   : > { %v1392_v14 = vpop.permute.xlu1 %1391 }
 0x182   : > { %v1395_v27 = vmul.f32 %v1392_v14, %v2533_v10 }
 0x183   : > { %v1387_v47 = vpop.permute.xlu0 %1386 }
 0x184   : > { %v1394_v15 = vmul.f32 %v1387_v47, %v2539_v17  ;;  %v1413_v35 = vadd.f32 %v1395_v27, %v1383_v60  ;;  %v2023_v47 = vld [vmem:[%s2422_s14 + $0x18] sm:$0xff] }
 0x185   : > { %v1404_v2 = vpop.permute.xlu1 %1403 }
 0x186   : > { %v1412_v28 = vadd.f32 %v1394_v15, %v1382_v58  ;;  %v1415_v16 = vadd.f32 %v1413_v35, %v1363_v43  ;;  %v1407_v44 = vmul.f32 %v1404_v2, %v2566_v8  ;;  %v2024_v15 = vld [vmem:[%s2422_s14 + $0x10] sm:$0xff] }
 0x187   : > { %v1399_v9 = vpop.permute.xlu0 %1398 }
 0x188   : > { %v1414_v26 = vadd.f32 %v1412_v28, %v1362_v20  ;;  %v1406_v22 = vmul.f32 %v1399_v9, %v2574_v25  ;;  %1928 = vst.msk [vmem:[%s2599_s7 + $0x48] sm:$0xff] %vm577_vm0, %v1415_v16  ;;  %v1409_v33 = vadd.f32 %v1407_v44, %v1383_v60  ;;  %v2026_v20 = vld [vmem:[%s2422_s14 + $0x28] sm:$0xff]  ;;  %v2027_v28 = vld [vmem:[%s2422_s14] sm:$0xff] }
 0x189   : > { %v1438_v3 = vpop.permute.xlu1 %1437 }
 0x18a   : > { %1927 = vst.msk [vmem:[%s2599_s7 + $0x40] sm:$0xff] %vm577_vm0, %v1414_v26  ;;  %v1408_v37 = vadd.f32 %v1406_v22, %v1382_v58  ;;  %v1411_v7 = vadd.f32 %v1409_v33, %v1359_v48 }
 0x18b   : > { %v1433_v51 = vpop.permute.xlu0 %1432 }
 0x18c   : > { %v1410_v29 = vadd.f32 %v1408_v37, %v1358_v12  ;;  %1926 = vst.msk [vmem:[%s2619_s12 + $0x48] sm:$0xff] %vm577_vm0, %v1411_v7  ;;  %v1440_v2 = vmul.f32 %v2027_v28, %v1433_v51  ;;  %v2029_v37 = vld [vmem:[%s2422_s14 + $0x38] sm:$0xff] }
 0x18d   : > { %v1450_v49 = vpop.permute.xlu1 %1449 }
 0x18e   : > { %1925 = vst.msk [vmem:[%s2619_s12 + $0x40] sm:$0xff] %vm577_vm0, %v1410_v29  ;;  %v1453_v27 = vmul.f32 %v1450_v49, %v2488_v55  ;;  %v2030_v49 = vld [vmem:[%s2422_s14 + $0x30] sm:$0xff] }
 0x18f   : > { %v1445_v39 = vpop.permute.xlu0 %1444 }
 0x190   : > { %v1452_v58 = vmul.f32 %v1445_v39, %v2485_v54 }
 0x191   : > { %v1462_v18 = vpop.permute.xlu1 %1461 }
 0x192   : > { %v1468_v26 = vadd.f32 %v1452_v58, %v1440_v2 }
 0x193   : > { %v1457_v41 = vpop.permute.xlu0 %1456 }
 0x195   : > { %v1486_v31 = vpop.permute.xlu1 %1485 }
 0x196   : > { %v1489_v21 = vmul.f32 %v2023_v47, %v1486_v31 }
 0x197   : > { %v1481_v19 = vpop.permute.xlu0 %1480 }
 0x198   : > { %v1488_v40 = vmul.f32 %v2024_v15, %v1481_v19 }
 0x199   : > { %v1498_v53 = vpop.permute.xlu1 %1497 }
 0x19a   : > { %v1501_v11 = vmul.f32 %v1498_v53, %v2461_v45  ;;  %v2025_v45 = vld [vmem:[%s2422_s14 + $0x8] sm:$0xff] }
 0x19b   : > { %v1493_v42 = vpop.permute.xlu0 %1492  ;;  %v1441_v35 = vmul.f32 %v2025_v45, %v1438_v3 }
 0x19c   : > { %v1500_v60 = vmul.f32 %v1493_v42, %v2471_v50  ;;  %v1519_v59 = vadd.f32 %v1501_v11, %v1489_v21 }
 0x19d   : > { %v1510_v1 = vpop.permute.xlu1 %1509  ;;  %v1469_v44 = vadd.f32 %v1453_v27, %v1441_v35 }
 0x19e   : > { %v1513_v50 = vmul.f32 %v1510_v1, %v2511_v62  ;;  %v1464_v62 = vmul.f32 %v1457_v41, %v2508_v61 }
 0x19f   : > { %v1505_v24 = vpop.permute.xlu0 %1504  ;;  %v1521_v12 = vadd.f32 %v1519_v59, %v1469_v44 }
 0x1a0   : > { %v1512_v54 = vmul.f32 %v1505_v24, %v2514_v63  ;;  %v1515_v63 = vadd.f32 %v1513_v50, %v1489_v21  ;;  %v1466_v31 = vadd.f32 %v1464_v62, %v1440_v2 }
 0x1a1   : > { %v1538_v38 = vpop.permute.xlu1 %1537 }
 0x1a2   : > { %v1541_v55 = vmul.f32 %v2026_v20, %v1538_v38  ;;  %v1514_v29 = vadd.f32 %v1512_v54, %v1488_v40 }
 0x1a3   : > { %v1533_v36 = vpop.permute.xlu0 %1532 }
 0x1a4   : > { %v1540_v16 = vmul.f32 %v2028_v52, %v1533_v36  ;;  %v1516_v36 = vadd.f32 %v1514_v29, %v1466_v31 }
 0x1a5   : > { %v1550_v5 = vpop.permute.xlu1 %1549 }
 0x1a6   : > { %v1553_v32 = vmul.f32 %v1550_v5, %v2494_v57  ;;  %v1518_v57 = vadd.f32 %v1500_v60, %v1488_v40 }
 0x1a7   : > { %v1545_v46 = vpop.permute.xlu0 %1544 }
 0x1a8   : > { %v1552_v43 = vmul.f32 %v1545_v46, %v2517_v0  ;;  %v1465_v0 = vmul.f32 %v1462_v18, %v2491_v56  ;;  %v1571_v9 = vadd.f32 %v1553_v32, %v1541_v55  ;;  %v1520_v51 = vadd.f32 %v1518_v57, %v1468_v26 }
 0x1a9   : > { %v1562_v14 = vpop.permute.xlu1 %1561 }
 0x1aa   : > { %v1565_v6 = vmul.f32 %v1562_v14, %v2524_v4  ;;  %v1570_v22 = vadd.f32 %v1552_v43, %v1540_v16  ;;  %v1467_v61 = vadd.f32 %v1465_v0, %v1441_v35  ;;  %v1573_v18 = vadd.f32 %v1571_v9, %v1521_v12 }
 0x1ab   : > { %v1557_v34 = vpop.permute.xlu0 %1556 }
 0x1ac   : > { %v1564_v48 = vmul.f32 %v1557_v34, %v3029_v30  ;;  %v1567_v30 = vadd.f32 %v1565_v6, %v1541_v55  ;;  %v1572_v19 = vadd.f32 %v1570_v22, %v1520_v51  ;;  %v1517_v1 = vadd.f32 %v1515_v63, %v1467_v61 }
 0x1ad   : > { %v1590_v23 = vpop.permute.xlu1 %1589 }
 0x1ae   : > { %v1593_v3 = vmul.f32 %v2029_v37, %v1590_v23  ;;  %v1566_v53 = vadd.f32 %v1564_v48, %v1540_v16  ;;  %v1569_v14 = vadd.f32 %v1567_v30, %v1517_v1 }
 0x1af   : > { %v1585_v13 = vpop.permute.xlu0 %1584 }
 0x1b0   : > { %v1592_v4 = vmul.f32 %v2030_v49, %v1585_v13  ;;  %v1568_v11 = vadd.f32 %v1566_v53, %v1516_v36 }
 0x1b1   : > { %v1602_v33 = vpop.permute.xlu1 %1601 }
 0x1b2   : > { %v1605_v7 = vmul.f32 %v1602_v33, %v2533_v10 }
 0x1b3   : > { %v1597_v56 = vpop.permute.xlu0 %1596 }
 0x1b4   : > { %v1604_v39 = vmul.f32 %v1597_v56, %v2539_v17  ;;  %v1623_v41 = vadd.f32 %v1605_v7, %v1593_v3 }
 0x1b5   : > { %v1614_v42 = vpop.permute.xlu1 %1613 }
 0x1b6   : > { %v1622_v10 = vadd.f32 %v1604_v39, %v1592_v4  ;;  %v1625_v24 = vadd.f32 %v1623_v41, %v1573_v18  ;;  %v1617_v17 = vmul.f32 %v1614_v42, %v2566_v8 }
 0x1b7   : > { %v1609_v38 = vpop.permute.xlu0 %1608 }
 0x1b8   : > { %v1624_v5 = vadd.f32 %v1622_v10, %v1572_v19  ;;  %v1616_v46 = vmul.f32 %v1609_v38, %v2574_v25  ;;  %1948 = vst.msk [vmem:[%s2599_s7 + $0x58] sm:$0xff] %vm577_vm0, %v1625_v24  ;;  %v1619_v8 = vadd.f32 %v1617_v17, %v1593_v3 }
 0x1ba   : > { %1947 = vst.msk [vmem:[%s2599_s7 + $0x50] sm:$0xff] %vm577_vm0, %v1624_v5  ;;  %v1618_v25 = vadd.f32 %v1616_v46, %v1592_v4  ;;  %v1621_v34 = vadd.f32 %v1619_v8, %v1569_v14 }
 0x1bb   : > { %2044 = shalt.err (!%p2041_p5)
}
 0x1bc   : > { %s2045_s7 = scalar_lea.hbm %s2916_s15, 1536  ;;  %s2049_s13 = scalar_lea.hbm %s3021_s5, 3072 }
 0x1bd   : > { %p2046_p6 = scmp.ne.s32.totalorder %s2916_s15, %s2045_s7  ;;  %p2050_p10 = scmp.lt.u32.totalorder %s2916_s15, %s3021_s5 }
 0x1be   : > { %p2051_p11 = scmp.lt.u32.totalorder %s2049_s13, %s2045_s7  ;;  %p2053_p13 = scmp.lt.u32.totalorder %s2045_s7, %s2916_s15 }
 0x1bf   : > { %p2047_p7 = pnand %p2046_p6, %p2218_p4 }
 0x1c0   : > { %p2052_p12 = por %p2051_p11, %p2050_p10 }
 0x1c1   : > { %p2048_p9 = pneg %p2047_p7 }
 0x1c2   : > { %p2054_p0 = por %p2053_p13, %p2052_p12 }
 0x1c4   : > { %p2055_p1 = pnand %p2054_p0, %p2048_p9 }
 0x1c6   : > { %2058 = shalt.err (!%p2055_p1)
}
 0x1c7   : > { %s2145_s25 = smov 128   ;;  %s2146_s8 = smov 8   ;;  %v1620_v60 = vadd.f32 %v1618_v25, %v1568_v11  ;;  %1946 = vst.msk [vmem:[%s2619_s12 + $0x58] sm:$0xff] %vm577_vm0, %v1621_v34 }
 0x1c8   : > { %1959 = dma.vmem_to_hbm [thread:$0]  (%p2218_p4), %s2918_s11, 1536, %s2916_s15, %s1638_s24, %s2145_s25, %s2145_s25, %s2146_s8  }
 0x1c9   : > { %s2957_s14 = scalar_lea.hbm %s3020_s4, %s1956_s10  ;;  %1945 = vst.msk [vmem:[%s2619_s12 + $0x50] sm:$0xff] %vm577_vm0, %v1620_v60  ;;  %s1633_s13 = scalar_lea.sflag [#allocation3], %s2563_s16 }
 0x1ca   : > { %s2059_s27 = scalar_lea.vmem %s2961_s17, 1536  ;;  %s2147_s21 = smov [#allocation2]  }
 0x1cb   : > { %p2060_p2 = scmp.ne.s32.totalorder %s2961_s17, %s2059_s27  ;;  %s2063_s11 = sshll.u32 %s2147_s21, 4  ;;  %s2064_s11 = int_to_ptr.vmem [resolvable:$false] %s2063_s11 }
 0x1cc   : > { %s2065_s10 = scalar_lea.vmem %s2064_s11, 3072  ;;  %p2066_p6 = scmp.lt.s32.totalorder %s2961_s17, %s2064_s11 }
 0x1cd   : > { %p2061_p3 = pnand %p2060_p2, %p2218_p4  ;;  %p2067_p7 = scmp.lt.s32.totalorder %s2065_s10, %s2059_s27 }
 0x1cf   : > { %p2062_p5 = pneg %p2061_p3  ;;  %p2068_p9 = por %p2067_p7, %p2066_p6 }
 0x1d1   : > { %p2069_p10 = pnand %p2068_p9, %p2062_p5 }
 0x1d3   : > { %2072 = shalt.err (!%p2069_p10)
}
 0x1d4   : > { %s2073_s12 = scalar_lea.hbm %s2957_s14, 1536  ;;  %s2077_s29 = scalar_lea.hbm %s3020_s4, 3072 }
 0x1d5   : > { %p2074_p11 = scmp.ne.s32.totalorder %s2957_s14, %s2073_s12  ;;  %p2078_p0 = scmp.lt.u32.totalorder %s2957_s14, %s3020_s4 }
 0x1d6   : > { %p2079_p1 = scmp.lt.u32.totalorder %s2077_s29, %s2073_s12  ;;  %p2081_p3 = scmp.lt.u32.totalorder %s2073_s12, %s2957_s14 }
 0x1d7   : > { %p2075_p12 = pnand %p2074_p11, %p2218_p4 }
 0x1d8   : > { %p2080_p2 = por %p2079_p1, %p2078_p0 }
 0x1d9   : > { %p2076_p13 = pneg %p2075_p12 }
 0x1da   : > { %p2082_p5 = por %p2081_p3, %p2080_p2 }
 0x1dc   : > { %p2083_p6 = pnand %p2082_p5, %p2076_p13 }
 0x1de   : > { %2086 = shalt.err (!%p2083_p6)
}
 0x1df   : > { %1958 = dma.vmem_to_hbm [thread:$0]  (%p2218_p4), %s2961_s17, 1536, %s2957_s14, %s1633_s13, %s2145_s25, %s2145_s25, %s2146_s8  }
 0x1e0 PF: > { %p1969_p7 = scmp.ge.s32.totalorder %s2141_s23, 2  ;;  %s1688_s27 = sand.u32 1, %s2121_s18  }
 0x1e1   : > { %s1689_s21 = scalar_lea.sflag [#allocation3], %s1688_s27 }
 0x1e2   : > { %p1963_p9 = pnand %p1969_p7, %p2225_p8 }
 0x1e4   : > { %2112 = dma.done.wait (!%p1963_p9), %s1689_s21, 1536  }
 0x1e5   : > { %2114 = vsyncadd (!%p1963_p9), %s1689_s21, 4294965760  ;;  %s1698_s28 = scalar_lea.sflag [#allocation5], %s1688_s27 }
 0x1e6   : > { %2116 = dma.done.wait (!%p1963_p9), %s1698_s28, 1536  }
 0x1e7   : > { %2118 = vsyncadd (!%p1963_p9), %s1698_s28, 4294965760  ;;  %s22_s23 = sadd.s32 1, %s2141_s23   ;;  %s3030_s18 = smov %s2125_s19 }
 0x1e8   : > { %p19_p10 = scmp.ge.s32.totalorder %s22_s23, 4   ;;  %s3031_s19 = smov %s2129_s20 }
 0x1e9   : > { %s3032_s20 = smov %s2231_s6  ;;  %s3033_s21 = smov %s2137_s22 }
 0x1ea   : > { %s3034_s22 = smov %s3036_s26  ;;  %21 = sbr.rel (!%p19_p10) target bundleno = 6 (0x6), region = 153 }
 0x1f1   :  { %1703 = vsyncpa [#allocation3], 1 }
 0x1f2   :  { %1705 = vsyncpa [#allocation3 + $0x1], 1 }
 0x1f3   :  { %1706 = vsyncpa [#allocation5], 1 }
 0x1f4   :  { %1708 = vsyncpa [#allocation5 + $0x1], 1 }

</bundles_post_ra>
